<compile_context>
chip_gen: v5e
topology: v5e:2x2
jax: 0.10.0
libtpu: 0.0.40
codegen_flags: <defaults>
</compile_context>

<pallas_src>
import jax
import jax.numpy as jnp
from jax.experimental import pallas as pl
from jax.experimental.pallas import tpu as pltpu

OC = 8        # conv out channels
KH = KW = 3   # conv kernel size (stride=1, padding=1)


def _fused_kernel(x_ref, wb_ref, out_ref, xd_ref):
    # x_ref  : (H, W)             f32  unpadded input plane          (VMEM)
    # wb_ref : (OC/2, 10, 2W)     f32  9 taps + bias, channel-pair packed:
    #                                  chan 2p in lanes [0,W), 2p+1 in [W,2W)
    # out_ref: (OC/2, H, 2W)      f32  2*relu(conv), channel-pair packed
    # xd_ref : (3, H+2, 2W)       f32  scratch: per-dx shifted, zero-padded,
    #                                  lane-duplicated input planes
    H, W = x_ref.shape
    W2 = 2 * W

    # ---- build the three dx-shifted / padded / duplicated planes once ------
    xd_ref[...] = jnp.zeros_like(xd_ref)          # halo rows (0 and H+1) -> 0
    x_c = x_ref[...]                                             # tap dx = 1
    zcol = jnp.zeros((H, 1), jnp.float32)
    x_l = jnp.concatenate([zcol, x_c[:, :W - 1]], axis=1)        # tap dx = 0
    x_r = jnp.concatenate([x_c[:, 1:], zcol], axis=1)            # tap dx = 2
    xd_ref[0, 1:H + 1, :] = jnp.concatenate([x_l, x_l], axis=1)
    xd_ref[1, 1:H + 1, :] = jnp.concatenate([x_c, x_c], axis=1)
    xd_ref[2, 1:H + 1, :] = jnp.concatenate([x_r, x_r], axis=1)

    # ---- 3x3 conv: 9 row-broadcast MACs per channel pair (full 128 lanes) --
    for p in range(OC // 2):
        acc = jnp.broadcast_to(wb_ref[p, KH * KW:KH * KW + 1, :], (H, W2))  # bias
        for dy in range(KH):
            for dx in range(KW):
                t = dy * KW + dx
                acc = acc + wb_ref[p, t:t + 1, :] * xd_ref[dx, dy:dy + H, :]
        # relu(cat) + relu(cat) with identical branches == 2 * relu(conv)
        out_ref[p] = 2.0 * jnp.maximum(acc, 0.0)


@jax.jit
def model_forward(x, w, b):
    """x: (1, 1, H, W) NCHW, w: (OC, 1, 3, 3), b: (OC,)."""
    N, C, H, W = x.shape
    assert N == 1 and C == 1 and H % 2 == 0 and W % 2 == 0

    x2d = x.reshape(H, W).astype(jnp.float32)

    # Pack (9 taps + bias) per channel pair along the 128-lane axis.
    wf = w.reshape(OC, KH * KW).astype(jnp.float32)                    # (OC, 9)
    wb = jnp.concatenate([wf, b.reshape(OC, 1).astype(jnp.float32)], axis=1)
    wb = wb.reshape(OC // 2, 2, KH * KW + 1)                           # (4,2,10)
    wb_packed = jnp.broadcast_to(wb[:, :, :, None],
                                 (OC // 2, 2, KH * KW + 1, W))
    wb_packed = wb_packed.transpose(0, 2, 1, 3).reshape(
        OC // 2, KH * KW + 1, 2 * W)                                   # (4,10,2W)

    out = pl.pallas_call(
        _fused_kernel,
        out_shape=jax.ShapeDtypeStruct((OC // 2, H, 2 * W), jnp.float32),
        in_specs=[
            pl.BlockSpec(memory_space=pltpu.MemorySpace.VMEM),   # x plane
            pl.BlockSpec(memory_space=pltpu.MemorySpace.VMEM),   # packed w,b
        ],
        out_specs=pl.BlockSpec(memory_space=pltpu.MemorySpace.VMEM),
        scratch_shapes=[pltpu.VMEM((3, H + 2, 2 * W), jnp.float32)],
    )(x2d, wb_packed)

    # Unpack channel pairs -> NCHW; nearest 0.5x == even rows / even cols.
    high = out.reshape(OC // 2, H, 2, W).transpose(0, 2, 1, 3).reshape(OC, H, W)
    low = high[:, ::2, ::2]
    return low[None], high[None]   # NCHW: (1, 8, H/2, W/2), (1, 8, H, W)


if __name__ == "__main__":
    key = jax.random.PRNGKey(0)
    kx, kw, kb = jax.random.split(key, 3)
    H = W = 64
    x = jax.random.normal(kx, (1, 1, H, W), dtype=jnp.float32)

    # Deterministic Conv2d(1, 8, 3) parameters (uniform like PyTorch default).
    fan_in = 1 * KH * KW
    bound = 1.0 / (fan_in ** 0.5)
    w = jax.random.uniform(kw, (OC, 1, KH, KW), minval=-bound, maxval=bound,
                           dtype=jnp.float32)
    b = jax.random.uniform(kb, (OC,), minval=-bound, maxval=bound,
                           dtype=jnp.float32)

    low, high = model_forward(x, w, b)
    jax.block_until_ready((low, high))

    # Plain-JAX reference for correctness.
    conv = jax.lax.conv_general_dilated(
        x, w, window_strides=(1, 1), padding=((1, 1), (1, 1)),
        dimension_numbers=("NCHW", "OIHW", "NCHW")) + b.reshape(1, OC, 1, 1)
    ref_high = 2.0 * jnp.maximum(conv, 0.0)          # relu(v3) + relu(v8)
    ref_low = ref_high[:, :, ::2, ::2]               # relu(v2) + relu(v7)

    assert high.shape == (1, OC, H, W) and low.shape == (1, OC, H // 2, W // 2)
    assert jnp.allclose(high, ref_high, atol=1e-4, rtol=1e-4)
    assert jnp.allclose(low, ref_low, atol=1e-4, rtol=1e-4)
    print("KERNEL_OK")
</pallas_src>

<mosaic_0001>
module attributes {stable_mosaic.version = 11 : i64} {
  func.func @_fused_kernel(%arg0: memref<64x64xf32, #tpu.memory_space<vmem>>, %arg1: memref<4x10x128xf32, #tpu.memory_space<vmem>>, %arg2: memref<4x64x128xf32, #tpu.memory_space<vmem>>, %arg3: memref<3x66x128xf32, #tpu.memory_space<vmem>>) attributes {dimension_semantics = [], scalar_prefetch = 0 : i64, scratch_operands = 1 : i64, tpu.core_type = #tpu.core_type<tc>} {
    %cst = arith.constant 0.000000e+00 : f32
    %0 = vector.broadcast %cst : f32 to vector<3x66x128xf32>
    %c0 = arith.constant 0 : index
    %c0_0 = arith.constant 0 : index
    %c0_1 = arith.constant 0 : index
    %1 = vector.load %arg3[%c0, %c0_0, %c0_1] : memref<3x66x128xf32, #tpu.memory_space<vmem>>, vector<3x66x128xf32>
    tpu.vector_store %arg3[%c0, %c0_0, %c0_1], %0 {strides = array<i32>} : memref<3x66x128xf32, #tpu.memory_space<vmem>>, vector<3x66x128xf32>,
    %c0_2 = arith.constant 0 : index
    %c0_3 = arith.constant 0 : index
    %2 = vector.load %arg0[%c0_2, %c0_3] : memref<64x64xf32, #tpu.memory_space<vmem>>, vector<64x64xf32>
    %cst_4 = arith.constant 0.000000e+00 : f32
    %3 = vector.broadcast %cst_4 : f32 to vector<64x1xf32>
    %4 = vector.extract_strided_slice %2 {offsets = [0, 0], sizes = [64, 63], strides = [1, 1]} : vector<64x64xf32> to vector<64x63xf32>
    %5 = tpu.concatenate %3, %4 in 1 : vector<64x1xf32>, vector<64x63xf32> -> vector<64x64xf32>
    %6 = vector.extract_strided_slice %2 {offsets = [0, 1], sizes = [64, 63], strides = [1, 1]} : vector<64x64xf32> to vector<64x63xf32>
    %7 = tpu.concatenate %6, %3 in 1 : vector<64x63xf32>, vector<64x1xf32> -> vector<64x64xf32>
    %8 = tpu.concatenate %5, %5 in 1 : vector<64x64xf32>, vector<64x64xf32> -> vector<64x128xf32>
    %c0_5 = arith.constant 0 : index
    %c1 = arith.constant 1 : index
    %c0_6 = arith.constant 0 : index
    %9 = vector.load %arg3[%c0_5, %c1, %c0_6] : memref<3x66x128xf32, #tpu.memory_space<vmem>>, vector<1x64x128xf32>
    %10 = vector.shape_cast %9 : vector<1x64x128xf32> to vector<64x128xf32>
    %11 = vector.shape_cast %8 : vector<64x128xf32> to vector<1x64x128xf32>
    tpu.vector_store %arg3[%c0_5, %c1, %c0_6], %11 {strides = array<i32>} : memref<3x66x128xf32, #tpu.memory_space<vmem>>, vector<1x64x128xf32>,
    %12 = tpu.concatenate %2, %2 in 1 : vector<64x64xf32>, vector<64x64xf32> -> vector<64x128xf32>
    %c1_7 = arith.constant 1 : index
    %c1_8 = arith.constant 1 : index
    %c0_9 = arith.constant 0 : index
    %13 = vector.load %arg3[%c1_7, %c1_8, %c0_9] : memref<3x66x128xf32, #tpu.memory_space<vmem>>, vector<1x64x128xf32>
    %14 = vector.shape_cast %13 : vector<1x64x128xf32> to vector<64x128xf32>
    %15 = vector.shape_cast %12 : vector<64x128xf32> to vector<1x64x128xf32>
    tpu.vector_store %arg3[%c1_7, %c1_8, %c0_9], %15 {strides = array<i32>} : memref<3x66x128xf32, #tpu.memory_space<vmem>>, vector<1x64x128xf32>,
    %16 = tpu.concatenate %7, %7 in 1 : vector<64x64xf32>, vector<64x64xf32> -> vector<64x128xf32>
    %c2 = arith.constant 2 : index
    %c1_10 = arith.constant 1 : index
    %c0_11 = arith.constant 0 : index
    %17 = vector.load %arg3[%c2, %c1_10, %c0_11] : memref<3x66x128xf32, #tpu.memory_space<vmem>>, vector<1x64x128xf32>
    %18 = vector.shape_cast %17 : vector<1x64x128xf32> to vector<64x128xf32>
    %19 = vector.shape_cast %16 : vector<64x128xf32> to vector<1x64x128xf32>
    tpu.vector_store %arg3[%c2, %c1_10, %c0_11], %19 {strides = array<i32>} : memref<3x66x128xf32, #tpu.memory_space<vmem>>, vector<1x64x128xf32>,
    %c0_12 = arith.constant 0 : index
    %c9 = arith.constant 9 : index
    %c0_13 = arith.constant 0 : index
    %20 = vector.load %arg1[%c0_12, %c9, %c0_13] : memref<4x10x128xf32, #tpu.memory_space<vmem>>, vector<1x1x128xf32>
    %21 = vector.shape_cast %20 : vector<1x1x128xf32> to vector<1x128xf32>
    %22 = vector.shape_cast %21 : vector<1x128xf32> to vector<1x128xf32>
    %23 = vector.broadcast %22 : vector<1x128xf32> to vector<64x128xf32>
    %c0_14 = arith.constant 0 : index
    %c0_15 = arith.constant 0 : index
    %c0_16 = arith.constant 0 : index
    %24 = vector.load %arg1[%c0_14, %c0_15, %c0_16] : memref<4x10x128xf32, #tpu.memory_space<vmem>>, vector<1x1x128xf32>
    %25 = vector.shape_cast %24 : vector<1x1x128xf32> to vector<1x128xf32>
    %c0_17 = arith.constant 0 : index
    %c0_18 = arith.constant 0 : index
    %c0_19 = arith.constant 0 : index
    %26 = vector.load %arg3[%c0_17, %c0_18, %c0_19] : memref<3x66x128xf32, #tpu.memory_space<vmem>>, vector<1x64x128xf32>
    %27 = vector.shape_cast %26 : vector<1x64x128xf32> to vector<64x128xf32>
    %28 = vector.broadcast %25 : vector<1x128xf32> to vector<64x128xf32>
    %29 = arith.mulf %28, %27 : vector<64x128xf32>
    %30 = arith.addf %23, %29 : vector<64x128xf32>
    %c0_20 = arith.constant 0 : index
    %c1_21 = arith.constant 1 : index
    %c0_22 = arith.constant 0 : index
    %31 = vector.load %arg1[%c0_20, %c1_21, %c0_22] : memref<4x10x128xf32, #tpu.memory_space<vmem>>, vector<1x1x128xf32>
    %32 = vector.shape_cast %31 : vector<1x1x128xf32> to vector<1x128xf32>
    %c1_23 = arith.constant 1 : index
    %c0_24 = arith.constant 0 : index
    %c0_25 = arith.constant 0 : index
    %33 = vector.load %arg3[%c1_23, %c0_24, %c0_25] : memref<3x66x128xf32, #tpu.memory_space<vmem>>, vector<1x64x128xf32>
    %34 = vector.shape_cast %33 : vector<1x64x128xf32> to vector<64x128xf32>
    %35 = vector.broadcast %32 : vector<1x128xf32> to vector<64x128xf32>
    %36 = arith.mulf %35, %34 : vector<64x128xf32>
    %37 = arith.addf %30, %36 : vector<64x128xf32>
    %c0_26 = arith.constant 0 : index
    %c2_27 = arith.constant 2 : index
    %c0_28 = arith.constant 0 : index
    %38 = vector.load %arg1[%c0_26, %c2_27, %c0_28] : memref<4x10x128xf32, #tpu.memory_space<vmem>>, vector<1x1x128xf32>
    %39 = vector.shape_cast %38 : vector<1x1x128xf32> to vector<1x128xf32>
    %c2_29 = arith.constant 2 : index
    %c0_30 = arith.constant 0 : index
    %c0_31 = arith.constant 0 : index
    %40 = vector.load %arg3[%c2_29, %c0_30, %c0_31] : memref<3x66x128xf32, #tpu.memory_space<vmem>>, vector<1x64x128xf32>
    %41 = vector.shape_cast %40 : vector<1x64x128xf32> to vector<64x128xf32>
    %42 = vector.broadcast %39 : vector<1x128xf32> to vector<64x128xf32>
    %43 = arith.mulf %42, %41 : vector<64x128xf32>
    %44 = arith.addf %37, %43 : vector<64x128xf32>
    %c0_32 = arith.constant 0 : index
    %c3 = arith.constant 3 : index
    %c0_33 = arith.constant 0 : index
    %45 = vector.load %arg1[%c0_32, %c3, %c0_33] : memref<4x10x128xf32, #tpu.memory_space<vmem>>, vector<1x1x128xf32>
    %46 = vector.shape_cast %45 : vector<1x1x128xf32> to vector<1x128xf32>
    %c0_34 = arith.constant 0 : index
    %c1_35 = arith.constant 1 : index
    %c0_36 = arith.constant 0 : index
    %47 = vector.load %arg3[%c0_34, %c1_35, %c0_36] : memref<3x66x128xf32, #tpu.memory_space<vmem>>, vector<1x64x128xf32>
    %48 = vector.shape_cast %47 : vector<1x64x128xf32> to vector<64x128xf32>
    %49 = vector.broadcast %46 : vector<1x128xf32> to vector<64x128xf32>
    %50 = arith.mulf %49, %48 : vector<64x128xf32>
    %51 = arith.addf %44, %50 : vector<64x128xf32>
    %c0_37 = arith.constant 0 : index
    %c4 = arith.constant 4 : index
    %c0_38 = arith.constant 0 : index
    %52 = vector.load %arg1[%c0_37, %c4, %c0_38] : memref<4x10x128xf32, #tpu.memory_space<vmem>>, vector<1x1x128xf32>
    %53 = vector.shape_cast %52 : vector<1x1x128xf32> to vector<1x128xf32>
    %c1_39 = arith.constant 1 : index
    %c1_40 = arith.constant 1 : index
    %c0_41 = arith.constant 0 : index
    %54 = vector.load %arg3[%c1_39, %c1_40, %c0_41] : memref<3x66x128xf32, #tpu.memory_space<vmem>>, vector<1x64x128xf32>
    %55 = vector.shape_cast %54 : vector<1x64x128xf32> to vector<64x128xf32>
    %56 = vector.broadcast %53 : vector<1x128xf32> to vector<64x128xf32>
    %57 = arith.mulf %56, %55 : vector<64x128xf32>
    %58 = arith.addf %51, %57 : vector<64x128xf32>
    %c0_42 = arith.constant 0 : index
    %c5 = arith.constant 5 : index
    %c0_43 = arith.constant 0 : index
    %59 = vector.load %arg1[%c0_42, %c5, %c0_43] : memref<4x10x128xf32, #tpu.memory_space<vmem>>, vector<1x1x128xf32>
    %60 = vector.shape_cast %59 : vector<1x1x128xf32> to vector<1x128xf32>
    %c2_44 = arith.constant 2 : index
    %c1_45 = arith.constant 1 : index
    %c0_46 = arith.constant 0 : index
    %61 = vector.load %arg3[%c2_44, %c1_45, %c0_46] : memref<3x66x128xf32, #tpu.memory_space<vmem>>, vector<1x64x128xf32>
    %62 = vector.shape_cast %61 : vector<1x64x128xf32> to vector<64x128xf32>
    %63 = vector.broadcast %60 : vector<1x128xf32> to vector<64x128xf32>
    %64 = arith.mulf %63, %62 : vector<64x128xf32>
    %65 = arith.addf %58, %64 : vector<64x128xf32>
    %c0_47 = arith.constant 0 : index
    %c6 = arith.constant 6 : index
    %c0_48 = arith.constant 0 : index
    %66 = vector.load %arg1[%c0_47, %c6, %c0_48] : memref<4x10x128xf32, #tpu.memory_space<vmem>>, vector<1x1x128xf32>
    %67 = vector.shape_cast %66 : vector<1x1x128xf32> to vector<1x128xf32>
    %c0_49 = arith.constant 0 : index
    %c2_50 = arith.constant 2 : index
    %c0_51 = arith.constant 0 : index
    %68 = vector.load %arg3[%c0_49, %c2_50, %c0_51] : memref<3x66x128xf32, #tpu.memory_space<vmem>>, vector<1x64x128xf32>
    %69 = vector.shape_cast %68 : vector<1x64x128xf32> to vector<64x128xf32>
    %70 = vector.broadcast %67 : vector<1x128xf32> to vector<64x128xf32>
    %71 = arith.mulf %70, %69 : vector<64x128xf32>
    %72 = arith.addf %65, %71 : vector<64x128xf32>
    %c0_52 = arith.constant 0 : index
    %c7 = arith.constant 7 : index
    %c0_53 = arith.constant 0 : index
    %73 = vector.load %arg1[%c0_52, %c7, %c0_53] : memref<4x10x128xf32, #tpu.memory_space<vmem>>, vector<1x1x128xf32>
    %74 = vector.shape_cast %73 : vector<1x1x128xf32> to vector<1x128xf32>
    %c1_54 = arith.constant 1 : index
    %c2_55 = arith.constant 2 : index
    %c0_56 = arith.constant 0 : index
    %75 = vector.load %arg3[%c1_54, %c2_55, %c0_56] : memref<3x66x128xf32, #tpu.memory_space<vmem>>, vector<1x64x128xf32>
    %76 = vector.shape_cast %75 : vector<1x64x128xf32> to vector<64x128xf32>
    %77 = vector.broadcast %74 : vector<1x128xf32> to vector<64x128xf32>
    %78 = arith.mulf %77, %76 : vector<64x128xf32>
    %79 = arith.addf %72, %78 : vector<64x128xf32>
    %c0_57 = arith.constant 0 : index
    %c8 = arith.constant 8 : index
    %c0_58 = arith.constant 0 : index
    %80 = vector.load %arg1[%c0_57, %c8, %c0_58] : memref<4x10x128xf32, #tpu.memory_space<vmem>>, vector<1x1x128xf32>
    %81 = vector.shape_cast %80 : vector<1x1x128xf32> to vector<1x128xf32>
    %c2_59 = arith.constant 2 : index
    %c2_60 = arith.constant 2 : index
    %c0_61 = arith.constant 0 : index
    %82 = vector.load %arg3[%c2_59, %c2_60, %c0_61] : memref<3x66x128xf32, #tpu.memory_space<vmem>>, vector<1x64x128xf32>
    %83 = vector.shape_cast %82 : vector<1x64x128xf32> to vector<64x128xf32>
    %84 = vector.broadcast %81 : vector<1x128xf32> to vector<64x128xf32>
    %85 = arith.mulf %84, %83 : vector<64x128xf32>
    %86 = arith.addf %79, %85 : vector<64x128xf32>
    %cst_62 = arith.constant 0.000000e+00 : f32
    %87 = vector.broadcast %cst_62 : f32 to vector<64x128xf32>
    %88 = arith.maximumf %86, %87 : vector<64x128xf32>
    %cst_63 = arith.constant 2.000000e+00 : f32
    %89 = vector.broadcast %cst_63 : f32 to vector<64x128xf32>
    %90 = arith.mulf %89, %88 : vector<64x128xf32>
    %c0_64 = arith.constant 0 : index
    %c0_65 = arith.constant 0 : index
    %c0_66 = arith.constant 0 : index
    %91 = vector.load %arg2[%c0_64, %c0_65, %c0_66] : memref<4x64x128xf32, #tpu.memory_space<vmem>>, vector<1x64x128xf32>
    %92 = vector.shape_cast %91 : vector<1x64x128xf32> to vector<64x128xf32>
    %93 = vector.shape_cast %90 : vector<64x128xf32> to vector<1x64x128xf32>
    tpu.vector_store %arg2[%c0_64, %c0_65, %c0_66], %93 {strides = array<i32>} : memref<4x64x128xf32, #tpu.memory_space<vmem>>, vector<1x64x128xf32>,
    %c1_67 = arith.constant 1 : index
    %c9_68 = arith.constant 9 : index
    %c0_69 = arith.constant 0 : index
    %94 = vector.load %arg1[%c1_67, %c9_68, %c0_69] : memref<4x10x128xf32, #tpu.memory_space<vmem>>, vector<1x1x128xf32>
    %95 = vector.shape_cast %94 : vector<1x1x128xf32> to vector<1x128xf32>
    %96 = vector.shape_cast %95 : vector<1x128xf32> to vector<1x128xf32>
    %97 = vector.broadcast %96 : vector<1x128xf32> to vector<64x128xf32>
    %c1_70 = arith.constant 1 : index
    %c0_71 = arith.constant 0 : index
    %c0_72 = arith.constant 0 : index
    %98 = vector.load %arg1[%c1_70, %c0_71, %c0_72] : memref<4x10x128xf32, #tpu.memory_space<vmem>>, vector<1x1x128xf32>
    %99 = vector.shape_cast %98 : vector<1x1x128xf32> to vector<1x128xf32>
    %c0_73 = arith.constant 0 : index
    %c0_74 = arith.constant 0 : index
    %c0_75 = arith.constant 0 : index
    %100 = vector.load %arg3[%c0_73, %c0_74, %c0_75] : memref<3x66x128xf32, #tpu.memory_space<vmem>>, vector<1x64x128xf32>
    %101 = vector.shape_cast %100 : vector<1x64x128xf32> to vector<64x128xf32>
    %102 = vector.broadcast %99 : vector<1x128xf32> to vector<64x128xf32>
    %103 = arith.mulf %102, %101 : vector<64x128xf32>
    %104 = arith.addf %97, %103 : vector<64x128xf32>
    %c1_76 = arith.constant 1 : index
    %c1_77 = arith.constant 1 : index
    %c0_78 = arith.constant 0 : index
    %105 = vector.load %arg1[%c1_76, %c1_77, %c0_78] : memref<4x10x128xf32, #tpu.memory_space<vmem>>, vector<1x1x128xf32>
    %106 = vector.shape_cast %105 : vector<1x1x128xf32> to vector<1x128xf32>
    %c1_79 = arith.constant 1 : index
    %c0_80 = arith.constant 0 : index
    %c0_81 = arith.constant 0 : index
    %107 = vector.load %arg3[%c1_79, %c0_80, %c0_81] : memref<3x66x128xf32, #tpu.memory_space<vmem>>, vector<1x64x128xf32>
    %108 = vector.shape_cast %107 : vector<1x64x128xf32> to vector<64x128xf32>
    %109 = vector.broadcast %106 : vector<1x128xf32> to vector<64x128xf32>
    %110 = arith.mulf %109, %108 : vector<64x128xf32>
    %111 = arith.addf %104, %110 : vector<64x128xf32>
    %c1_82 = arith.constant 1 : index
    %c2_83 = arith.constant 2 : index
    %c0_84 = arith.constant 0 : index
    %112 = vector.load %arg1[%c1_82, %c2_83, %c0_84] : memref<4x10x128xf32, #tpu.memory_space<vmem>>, vector<1x1x128xf32>
    %113 = vector.shape_cast %112 : vector<1x1x128xf32> to vector<1x128xf32>
    %c2_85 = arith.constant 2 : index
    %c0_86 = arith.constant 0 : index
    %c0_87 = arith.constant 0 : index
    %114 = vector.load %arg3[%c2_85, %c0_86, %c0_87] : memref<3x66x128xf32, #tpu.memory_space<vmem>>, vector<1x64x128xf32>
    %115 = vector.shape_cast %114 : vector<1x64x128xf32> to vector<64x128xf32>
    %116 = vector.broadcast %113 : vector<1x128xf32> to vector<64x128xf32>
    %117 = arith.mulf %116, %115 : vector<64x128xf32>
    %118 = arith.addf %111, %117 : vector<64x128xf32>
    %c1_88 = arith.constant 1 : index
    %c3_89 = arith.constant 3 : index
    %c0_90 = arith.constant 0 : index
    %119 = vector.load %arg1[%c1_88, %c3_89, %c0_90] : memref<4x10x128xf32, #tpu.memory_space<vmem>>, vector<1x1x128xf32>
    %120 = vector.shape_cast %119 : vector<1x1x128xf32> to vector<1x128xf32>
    %c0_91 = arith.constant 0 : index
    %c1_92 = arith.constant 1 : index
    %c0_93 = arith.constant 0 : index
    %121 = vector.load %arg3[%c0_91, %c1_92, %c0_93] : memref<3x66x128xf32, #tpu.memory_space<vmem>>, vector<1x64x128xf32>
    %122 = vector.shape_cast %121 : vector<1x64x128xf32> to vector<64x128xf32>
    %123 = vector.broadcast %120 : vector<1x128xf32> to vector<64x128xf32>
    %124 = arith.mulf %123, %122 : vector<64x128xf32>
    %125 = arith.addf %118, %124 : vector<64x128xf32>
    %c1_94 = arith.constant 1 : index
    %c4_95 = arith.constant 4 : index
    %c0_96 = arith.constant 0 : index
    %126 = vector.load %arg1[%c1_94, %c4_95, %c0_96] : memref<4x10x128xf32, #tpu.memory_space<vmem>>, vector<1x1x128xf32>
    %127 = vector.shape_cast %126 : vector<1x1x128xf32> to vector<1x128xf32>
    %c1_97 = arith.constant 1 : index
    %c1_98 = arith.constant 1 : index
    %c0_99 = arith.constant 0 : index
    %128 = vector.load %arg3[%c1_97, %c1_98, %c0_99] : memref<3x66x128xf32, #tpu.memory_space<vmem>>, vector<1x64x128xf32>
    %129 = vector.shape_cast %128 : vector<1x64x128xf32> to vector<64x128xf32>
    %130 = vector.broadcast %127 : vector<1x128xf32> to vector<64x128xf32>
    %131 = arith.mulf %130, %129 : vector<64x128xf32>
    %132 = arith.addf %125, %131 : vector<64x128xf32>
    %c1_100 = arith.constant 1 : index
    %c5_101 = arith.constant 5 : index
    %c0_102 = arith.constant 0 : index
    %133 = vector.load %arg1[%c1_100, %c5_101, %c0_102] : memref<4x10x128xf32, #tpu.memory_space<vmem>>, vector<1x1x128xf32>
    %134 = vector.shape_cast %133 : vector<1x1x128xf32> to vector<1x128xf32>
    %c2_103 = arith.constant 2 : index
    %c1_104 = arith.constant 1 : index
    %c0_105 = arith.constant 0 : index
    %135 = vector.load %arg3[%c2_103, %c1_104, %c0_105] : memref<3x66x128xf32, #tpu.memory_space<vmem>>, vector<1x64x128xf32>
    %136 = vector.shape_cast %135 : vector<1x64x128xf32> to vector<64x128xf32>
    %137 = vector.broadcast %134 : vector<1x128xf32> to vector<64x128xf32>
    %138 = arith.mulf %137, %136 : vector<64x128xf32>
    %139 = arith.addf %132, %138 : vector<64x128xf32>
    %c1_106 = arith.constant 1 : index
    %c6_107 = arith.constant 6 : index
    %c0_108 = arith.constant 0 : index
    %140 = vector.load %arg1[%c1_106, %c6_107, %c0_108] : memref<4x10x128xf32, #tpu.memory_space<vmem>>, vector<1x1x128xf32>
    %141 = vector.shape_cast %140 : vector<1x1x128xf32> to vector<1x128xf32>
    %c0_109 = arith.constant 0 : index
    %c2_110 = arith.constant 2 : index
    %c0_111 = arith.constant 0 : index
    %142 = vector.load %arg3[%c0_109, %c2_110, %c0_111] : memref<3x66x128xf32, #tpu.memory_space<vmem>>, vector<1x64x128xf32>
    %143 = vector.shape_cast %142 : vector<1x64x128xf32> to vector<64x128xf32>
    %144 = vector.broadcast %141 : vector<1x128xf32> to vector<64x128xf32>
    %145 = arith.mulf %144, %143 : vector<64x128xf32>
    %146 = arith.addf %139, %145 : vector<64x128xf32>
    %c1_112 = arith.constant 1 : index
    %c7_113 = arith.constant 7 : index
    %c0_114 = arith.constant 0 : index
    %147 = vector.load %arg1[%c1_112, %c7_113, %c0_114] : memref<4x10x128xf32, #tpu.memory_space<vmem>>, vector<1x1x128xf32>
    %148 = vector.shape_cast %147 : vector<1x1x128xf32> to vector<1x128xf32>
    %c1_115 = arith.constant 1 : index
    %c2_116 = arith.constant 2 : index
    %c0_117 = arith.constant 0 : index
    %149 = vector.load %arg3[%c1_115, %c2_116, %c0_117] : memref<3x66x128xf32, #tpu.memory_space<vmem>>, vector<1x64x128xf32>
    %150 = vector.shape_cast %149 : vector<1x64x128xf32> to vector<64x128xf32>
    %151 = vector.broadcast %148 : vector<1x128xf32> to vector<64x128xf32>
    %152 = arith.mulf %151, %150 : vector<64x128xf32>
    %153 = arith.addf %146, %152 : vector<64x128xf32>
    %c1_118 = arith.constant 1 : index
    %c8_119 = arith.constant 8 : index
    %c0_120 = arith.constant 0 : index
    %154 = vector.load %arg1[%c1_118, %c8_119, %c0_120] : memref<4x10x128xf32, #tpu.memory_space<vmem>>, vector<1x1x128xf32>
    %155 = vector.shape_cast %154 : vector<1x1x128xf32> to vector<1x128xf32>
    %c2_121 = arith.constant 2 : index
    %c2_122 = arith.constant 2 : index
    %c0_123 = arith.constant 0 : index
    %156 = vector.load %arg3[%c2_121, %c2_122, %c0_123] : memref<3x66x128xf32, #tpu.memory_space<vmem>>, vector<1x64x128xf32>
    %157 = vector.shape_cast %156 : vector<1x64x128xf32> to vector<64x128xf32>
    %158 = vector.broadcast %155 : vector<1x128xf32> to vector<64x128xf32>
    %159 = arith.mulf %158, %157 : vector<64x128xf32>
    %160 = arith.addf %153, %159 : vector<64x128xf32>
    %cst_124 = arith.constant 0.000000e+00 : f32
    %161 = vector.broadcast %cst_124 : f32 to vector<64x128xf32>
    %162 = arith.maximumf %160, %161 : vector<64x128xf32>
    %cst_125 = arith.constant 2.000000e+00 : f32
    %163 = vector.broadcast %cst_125 : f32 to vector<64x128xf32>
    %164 = arith.mulf %163, %162 : vector<64x128xf32>
    %c1_126 = arith.constant 1 : index
    %c0_127 = arith.constant 0 : index
    %c0_128 = arith.constant 0 : index
    %165 = vector.load %arg2[%c1_126, %c0_127, %c0_128] : memref<4x64x128xf32, #tpu.memory_space<vmem>>, vector<1x64x128xf32>
    %166 = vector.shape_cast %165 : vector<1x64x128xf32> to vector<64x128xf32>
    %167 = vector.shape_cast %164 : vector<64x128xf32> to vector<1x64x128xf32>
    tpu.vector_store %arg2[%c1_126, %c0_127, %c0_128], %167 {strides = array<i32>} : memref<4x64x128xf32, #tpu.memory_space<vmem>>, vector<1x64x128xf32>,
    %c2_129 = arith.constant 2 : index
    %c9_130 = arith.constant 9 : index
    %c0_131 = arith.constant 0 : index
    %168 = vector.load %arg1[%c2_129, %c9_130, %c0_131] : memref<4x10x128xf32, #tpu.memory_space<vmem>>, vector<1x1x128xf32>
    %169 = vector.shape_cast %168 : vector<1x1x128xf32> to vector<1x128xf32>
    %170 = vector.shape_cast %169 : vector<1x128xf32> to vector<1x128xf32>
    %171 = vector.broadcast %170 : vector<1x128xf32> to vector<64x128xf32>
    %c2_132 = arith.constant 2 : index
    %c0_133 = arith.constant 0 : index
    %c0_134 = arith.constant 0 : index
    %172 = vector.load %arg1[%c2_132, %c0_133, %c0_134] : memref<4x10x128xf32, #tpu.memory_space<vmem>>, vector<1x1x128xf32>
    %173 = vector.shape_cast %172 : vector<1x1x128xf32> to vector<1x128xf32>
    %c0_135 = arith.constant 0 : index
    %c0_136 = arith.constant 0 : index
    %c0_137 = arith.constant 0 : index
    %174 = vector.load %arg3[%c0_135, %c0_136, %c0_137] : memref<3x66x128xf32, #tpu.memory_space<vmem>>, vector<1x64x128xf32>
    %175 = vector.shape_cast %174 : vector<1x64x128xf32> to vector<64x128xf32>
    %176 = vector.broadcast %173 : vector<1x128xf32> to vector<64x128xf32>
    %177 = arith.mulf %176, %175 : vector<64x128xf32>
    %178 = arith.addf %171, %177 : vector<64x128xf32>
    %c2_138 = arith.constant 2 : index
    %c1_139 = arith.constant 1 : index
    %c0_140 = arith.constant 0 : index
    %179 = vector.load %arg1[%c2_138, %c1_139, %c0_140] : memref<4x10x128xf32, #tpu.memory_space<vmem>>, vector<1x1x128xf32>
    %180 = vector.shape_cast %179 : vector<1x1x128xf32> to vector<1x128xf32>
    %c1_141 = arith.constant 1 : index
    %c0_142 = arith.constant 0 : index
    %c0_143 = arith.constant 0 : index
    %181 = vector.load %arg3[%c1_141, %c0_142, %c0_143] : memref<3x66x128xf32, #tpu.memory_space<vmem>>, vector<1x64x128xf32>
    %182 = vector.shape_cast %181 : vector<1x64x128xf32> to vector<64x128xf32>
    %183 = vector.broadcast %180 : vector<1x128xf32> to vector<64x128xf32>
    %184 = arith.mulf %183, %182 : vector<64x128xf32>
    %185 = arith.addf %178, %184 : vector<64x128xf32>
    %c2_144 = arith.constant 2 : index
    %c2_145 = arith.constant 2 : index
    %c0_146 = arith.constant 0 : index
    %186 = vector.load %arg1[%c2_144, %c2_145, %c0_146] : memref<4x10x128xf32, #tpu.memory_space<vmem>>, vector<1x1x128xf32>
    %187 = vector.shape_cast %186 : vector<1x1x128xf32> to vector<1x128xf32>
    %c2_147 = arith.constant 2 : index
    %c0_148 = arith.constant 0 : index
    %c0_149 = arith.constant 0 : index
    %188 = vector.load %arg3[%c2_147, %c0_148, %c0_149] : memref<3x66x128xf32, #tpu.memory_space<vmem>>, vector<1x64x128xf32>
    %189 = vector.shape_cast %188 : vector<1x64x128xf32> to vector<64x128xf32>
    %190 = vector.broadcast %187 : vector<1x128xf32> to vector<64x128xf32>
    %191 = arith.mulf %190, %189 : vector<64x128xf32>
    %192 = arith.addf %185, %191 : vector<64x128xf32>
    %c2_150 = arith.constant 2 : index
    %c3_151 = arith.constant 3 : index
    %c0_152 = arith.constant 0 : index
    %193 = vector.load %arg1[%c2_150, %c3_151, %c0_152] : memref<4x10x128xf32, #tpu.memory_space<vmem>>, vector<1x1x128xf32>
    %194 = vector.shape_cast %193 : vector<1x1x128xf32> to vector<1x128xf32>
    %c0_153 = arith.constant 0 : index
    %c1_154 = arith.constant 1 : index
    %c0_155 = arith.constant 0 : index
    %195 = vector.load %arg3[%c0_153, %c1_154, %c0_155] : memref<3x66x128xf32, #tpu.memory_space<vmem>>, vector<1x64x128xf32>
    %196 = vector.shape_cast %195 : vector<1x64x128xf32> to vector<64x128xf32>
    %197 = vector.broadcast %194 : vector<1x128xf32> to vector<64x128xf32>
    %198 = arith.mulf %197, %196 : vector<64x128xf32>
    %199 = arith.addf %192, %198 : vector<64x128xf32>
    %c2_156 = arith.constant 2 : index
    %c4_157 = arith.constant 4 : index
    %c0_158 = arith.constant 0 : index
    %200 = vector.load %arg1[%c2_156, %c4_157, %c0_158] : memref<4x10x128xf32, #tpu.memory_space<vmem>>, vector<1x1x128xf32>
    %201 = vector.shape_cast %200 : vector<1x1x128xf32> to vector<1x128xf32>
    %c1_159 = arith.constant 1 : index
    %c1_160 = arith.constant 1 : index
    %c0_161 = arith.constant 0 : index
    %202 = vector.load %arg3[%c1_159, %c1_160, %c0_161] : memref<3x66x128xf32, #tpu.memory_space<vmem>>, vector<1x64x128xf32>
    %203 = vector.shape_cast %202 : vector<1x64x128xf32> to vector<64x128xf32>
    %204 = vector.broadcast %201 : vector<1x128xf32> to vector<64x128xf32>
    %205 = arith.mulf %204, %203 : vector<64x128xf32>
    %206 = arith.addf %199, %205 : vector<64x128xf32>
    %c2_162 = arith.constant 2 : index
    %c5_163 = arith.constant 5 : index
    %c0_164 = arith.constant 0 : index
    %207 = vector.load %arg1[%c2_162, %c5_163, %c0_164] : memref<4x10x128xf32, #tpu.memory_space<vmem>>, vector<1x1x128xf32>
    %208 = vector.shape_cast %207 : vector<1x1x128xf32> to vector<1x128xf32>
    %c2_165 = arith.constant 2 : index
    %c1_166 = arith.constant 1 : index
    %c0_167 = arith.constant 0 : index
    %209 = vector.load %arg3[%c2_165, %c1_166, %c0_167] : memref<3x66x128xf32, #tpu.memory_space<vmem>>, vector<1x64x128xf32>
    %210 = vector.shape_cast %209 : vector<1x64x128xf32> to vector<64x128xf32>
    %211 = vector.broadcast %208 : vector<1x128xf32> to vector<64x128xf32>
    %212 = arith.mulf %211, %210 : vector<64x128xf32>
    %213 = arith.addf %206, %212 : vector<64x128xf32>
    %c2_168 = arith.constant 2 : index
    %c6_169 = arith.constant 6 : index
    %c0_170 = arith.constant 0 : index
    %214 = vector.load %arg1[%c2_168, %c6_169, %c0_170] : memref<4x10x128xf32, #tpu.memory_space<vmem>>, vector<1x1x128xf32>
    %215 = vector.shape_cast %214 : vector<1x1x128xf32> to vector<1x128xf32>
    %c0_171 = arith.constant 0 : index
    %c2_172 = arith.constant 2 : index
    %c0_173 = arith.constant 0 : index
    %216 = vector.load %arg3[%c0_171, %c2_172, %c0_173] : memref<3x66x128xf32, #tpu.memory_space<vmem>>, vector<1x64x128xf32>
    %217 = vector.shape_cast %216 : vector<1x64x128xf32> to vector<64x128xf32>
    %218 = vector.broadcast %215 : vector<1x128xf32> to vector<64x128xf32>
    %219 = arith.mulf %218, %217 : vector<64x128xf32>
    %220 = arith.addf %213, %219 : vector<64x128xf32>
    %c2_174 = arith.constant 2 : index
    %c7_175 = arith.constant 7 : index
    %c0_176 = arith.constant 0 : index
    %221 = vector.load %arg1[%c2_174, %c7_175, %c0_176] : memref<4x10x128xf32, #tpu.memory_space<vmem>>, vector<1x1x128xf32>
    %222 = vector.shape_cast %221 : vector<1x1x128xf32> to vector<1x128xf32>
    %c1_177 = arith.constant 1 : index
    %c2_178 = arith.constant 2 : index
    %c0_179 = arith.constant 0 : index
    %223 = vector.load %arg3[%c1_177, %c2_178, %c0_179] : memref<3x66x128xf32, #tpu.memory_space<vmem>>, vector<1x64x128xf32>
    %224 = vector.shape_cast %223 : vector<1x64x128xf32> to vector<64x128xf32>
    %225 = vector.broadcast %222 : vector<1x128xf32> to vector<64x128xf32>
    %226 = arith.mulf %225, %224 : vector<64x128xf32>
    %227 = arith.addf %220, %226 : vector<64x128xf32>
    %c2_180 = arith.constant 2 : index
    %c8_181 = arith.constant 8 : index
    %c0_182 = arith.constant 0 : index
    %228 = vector.load %arg1[%c2_180, %c8_181, %c0_182] : memref<4x10x128xf32, #tpu.memory_space<vmem>>, vector<1x1x128xf32>
    %229 = vector.shape_cast %228 : vector<1x1x128xf32> to vector<1x128xf32>
    %c2_183 = arith.constant 2 : index
    %c2_184 = arith.constant 2 : index
    %c0_185 = arith.constant 0 : index
    %230 = vector.load %arg3[%c2_183, %c2_184, %c0_185] : memref<3x66x128xf32, #tpu.memory_space<vmem>>, vector<1x64x128xf32>
    %231 = vector.shape_cast %230 : vector<1x64x128xf32> to vector<64x128xf32>
    %232 = vector.broadcast %229 : vector<1x128xf32> to vector<64x128xf32>
    %233 = arith.mulf %232, %231 : vector<64x128xf32>
    %234 = arith.addf %227, %233 : vector<64x128xf32>
    %cst_186 = arith.constant 0.000000e+00 : f32
    %235 = vector.broadcast %cst_186 : f32 to vector<64x128xf32>
    %236 = arith.maximumf %234, %235 : vector<64x128xf32>
    %cst_187 = arith.constant 2.000000e+00 : f32
    %237 = vector.broadcast %cst_187 : f32 to vector<64x128xf32>
    %238 = arith.mulf %237, %236 : vector<64x128xf32>
    %c2_188 = arith.constant 2 : index
    %c0_189 = arith.constant 0 : index
    %c0_190 = arith.constant 0 : index
    %239 = vector.load %arg2[%c2_188, %c0_189, %c0_190] : memref<4x64x128xf32, #tpu.memory_space<vmem>>, vector<1x64x128xf32>
    %240 = vector.shape_cast %239 : vector<1x64x128xf32> to vector<64x128xf32>
    %241 = vector.shape_cast %238 : vector<64x128xf32> to vector<1x64x128xf32>
    tpu.vector_store %arg2[%c2_188, %c0_189, %c0_190], %241 {strides = array<i32>} : memref<4x64x128xf32, #tpu.memory_space<vmem>>, vector<1x64x128xf32>,
    %c3_191 = arith.constant 3 : index
    %c9_192 = arith.constant 9 : index
    %c0_193 = arith.constant 0 : index
    %242 = vector.load %arg1[%c3_191, %c9_192, %c0_193] : memref<4x10x128xf32, #tpu.memory_space<vmem>>, vector<1x1x128xf32>
    %243 = vector.shape_cast %242 : vector<1x1x128xf32> to vector<1x128xf32>
    %244 = vector.shape_cast %243 : vector<1x128xf32> to vector<1x128xf32>
    %245 = vector.broadcast %244 : vector<1x128xf32> to vector<64x128xf32>
    %c3_194 = arith.constant 3 : index
    %c0_195 = arith.constant 0 : index
    %c0_196 = arith.constant 0 : index
    %246 = vector.load %arg1[%c3_194, %c0_195, %c0_196] : memref<4x10x128xf32, #tpu.memory_space<vmem>>, vector<1x1x128xf32>
    %247 = vector.shape_cast %246 : vector<1x1x128xf32> to vector<1x128xf32>
    %c0_197 = arith.constant 0 : index
    %c0_198 = arith.constant 0 : index
    %c0_199 = arith.constant 0 : index
    %248 = vector.load %arg3[%c0_197, %c0_198, %c0_199] : memref<3x66x128xf32, #tpu.memory_space<vmem>>, vector<1x64x128xf32>
    %249 = vector.shape_cast %248 : vector<1x64x128xf32> to vector<64x128xf32>
    %250 = vector.broadcast %247 : vector<1x128xf32> to vector<64x128xf32>
    %251 = arith.mulf %250, %249 : vector<64x128xf32>
    %252 = arith.addf %245, %251 : vector<64x128xf32>
    %c3_200 = arith.constant 3 : index
    %c1_201 = arith.constant 1 : index
    %c0_202 = arith.constant 0 : index
    %253 = vector.load %arg1[%c3_200, %c1_201, %c0_202] : memref<4x10x128xf32, #tpu.memory_space<vmem>>, vector<1x1x128xf32>
    %254 = vector.shape_cast %253 : vector<1x1x128xf32> to vector<1x128xf32>
    %c1_203 = arith.constant 1 : index
    %c0_204 = arith.constant 0 : index
    %c0_205 = arith.constant 0 : index
    %255 = vector.load %arg3[%c1_203, %c0_204, %c0_205] : memref<3x66x128xf32, #tpu.memory_space<vmem>>, vector<1x64x128xf32>
    %256 = vector.shape_cast %255 : vector<1x64x128xf32> to vector<64x128xf32>
    %257 = vector.broadcast %254 : vector<1x128xf32> to vector<64x128xf32>
    %258 = arith.mulf %257, %256 : vector<64x128xf32>
    %259 = arith.addf %252, %258 : vector<64x128xf32>
    %c3_206 = arith.constant 3 : index
    %c2_207 = arith.constant 2 : index
    %c0_208 = arith.constant 0 : index
    %260 = vector.load %arg1[%c3_206, %c2_207, %c0_208] : memref<4x10x128xf32, #tpu.memory_space<vmem>>, vector<1x1x128xf32>
    %261 = vector.shape_cast %260 : vector<1x1x128xf32> to vector<1x128xf32>
    %c2_209 = arith.constant 2 : index
    %c0_210 = arith.constant 0 : index
    %c0_211 = arith.constant 0 : index
    %262 = vector.load %arg3[%c2_209, %c0_210, %c0_211] : memref<3x66x128xf32, #tpu.memory_space<vmem>>, vector<1x64x128xf32>
    %263 = vector.shape_cast %262 : vector<1x64x128xf32> to vector<64x128xf32>
    %264 = vector.broadcast %261 : vector<1x128xf32> to vector<64x128xf32>
    %265 = arith.mulf %264, %263 : vector<64x128xf32>
    %266 = arith.addf %259, %265 : vector<64x128xf32>
    %c3_212 = arith.constant 3 : index
    %c3_213 = arith.constant 3 : index
    %c0_214 = arith.constant 0 : index
    %267 = vector.load %arg1[%c3_212, %c3_213, %c0_214] : memref<4x10x128xf32, #tpu.memory_space<vmem>>, vector<1x1x128xf32>
    %268 = vector.shape_cast %267 : vector<1x1x128xf32> to vector<1x128xf32>
    %c0_215 = arith.constant 0 : index
    %c1_216 = arith.constant 1 : index
    %c0_217 = arith.constant 0 : index
    %269 = vector.load %arg3[%c0_215, %c1_216, %c0_217] : memref<3x66x128xf32, #tpu.memory_space<vmem>>, vector<1x64x128xf32>
    %270 = vector.shape_cast %269 : vector<1x64x128xf32> to vector<64x128xf32>
    %271 = vector.broadcast %268 : vector<1x128xf32> to vector<64x128xf32>
    %272 = arith.mulf %271, %270 : vector<64x128xf32>
    %273 = arith.addf %266, %272 : vector<64x128xf32>
    %c3_218 = arith.constant 3 : index
    %c4_219 = arith.constant 4 : index
    %c0_220 = arith.constant 0 : index
    %274 = vector.load %arg1[%c3_218, %c4_219, %c0_220] : memref<4x10x128xf32, #tpu.memory_space<vmem>>, vector<1x1x128xf32>
    %275 = vector.shape_cast %274 : vector<1x1x128xf32> to vector<1x128xf32>
    %c1_221 = arith.constant 1 : index
    %c1_222 = arith.constant 1 : index
    %c0_223 = arith.constant 0 : index
    %276 = vector.load %arg3[%c1_221, %c1_222, %c0_223] : memref<3x66x128xf32, #tpu.memory_space<vmem>>, vector<1x64x128xf32>
    %277 = vector.shape_cast %276 : vector<1x64x128xf32> to vector<64x128xf32>
    %278 = vector.broadcast %275 : vector<1x128xf32> to vector<64x128xf32>
    %279 = arith.mulf %278, %277 : vector<64x128xf32>
    %280 = arith.addf %273, %279 : vector<64x128xf32>
    %c3_224 = arith.constant 3 : index
    %c5_225 = arith.constant 5 : index
    %c0_226 = arith.constant 0 : index
    %281 = vector.load %arg1[%c3_224, %c5_225, %c0_226] : memref<4x10x128xf32, #tpu.memory_space<vmem>>, vector<1x1x128xf32>
    %282 = vector.shape_cast %281 : vector<1x1x128xf32> to vector<1x128xf32>
    %c2_227 = arith.constant 2 : index
    %c1_228 = arith.constant 1 : index
    %c0_229 = arith.constant 0 : index
    %283 = vector.load %arg3[%c2_227, %c1_228, %c0_229] : memref<3x66x128xf32, #tpu.memory_space<vmem>>, vector<1x64x128xf32>
    %284 = vector.shape_cast %283 : vector<1x64x128xf32> to vector<64x128xf32>
    %285 = vector.broadcast %282 : vector<1x128xf32> to vector<64x128xf32>
    %286 = arith.mulf %285, %284 : vector<64x128xf32>
    %287 = arith.addf %280, %286 : vector<64x128xf32>
    %c3_230 = arith.constant 3 : index
    %c6_231 = arith.constant 6 : index
    %c0_232 = arith.constant 0 : index
    %288 = vector.load %arg1[%c3_230, %c6_231, %c0_232] : memref<4x10x128xf32, #tpu.memory_space<vmem>>, vector<1x1x128xf32>
    %289 = vector.shape_cast %288 : vector<1x1x128xf32> to vector<1x128xf32>
    %c0_233 = arith.constant 0 : index
    %c2_234 = arith.constant 2 : index
    %c0_235 = arith.constant 0 : index
    %290 = vector.load %arg3[%c0_233, %c2_234, %c0_235] : memref<3x66x128xf32, #tpu.memory_space<vmem>>, vector<1x64x128xf32>
    %291 = vector.shape_cast %290 : vector<1x64x128xf32> to vector<64x128xf32>
    %292 = vector.broadcast %289 : vector<1x128xf32> to vector<64x128xf32>
    %293 = arith.mulf %292, %291 : vector<64x128xf32>
    %294 = arith.addf %287, %293 : vector<64x128xf32>
    %c3_236 = arith.constant 3 : index
    %c7_237 = arith.constant 7 : index
    %c0_238 = arith.constant 0 : index
    %295 = vector.load %arg1[%c3_236, %c7_237, %c0_238] : memref<4x10x128xf32, #tpu.memory_space<vmem>>, vector<1x1x128xf32>
    %296 = vector.shape_cast %295 : vector<1x1x128xf32> to vector<1x128xf32>
    %c1_239 = arith.constant 1 : index
    %c2_240 = arith.constant 2 : index
    %c0_241 = arith.constant 0 : index
    %297 = vector.load %arg3[%c1_239, %c2_240, %c0_241] : memref<3x66x128xf32, #tpu.memory_space<vmem>>, vector<1x64x128xf32>
    %298 = vector.shape_cast %297 : vector<1x64x128xf32> to vector<64x128xf32>
    %299 = vector.broadcast %296 : vector<1x128xf32> to vector<64x128xf32>
    %300 = arith.mulf %299, %298 : vector<64x128xf32>
    %301 = arith.addf %294, %300 : vector<64x128xf32>
    %c3_242 = arith.constant 3 : index
    %c8_243 = arith.constant 8 : index
    %c0_244 = arith.constant 0 : index
    %302 = vector.load %arg1[%c3_242, %c8_243, %c0_244] : memref<4x10x128xf32, #tpu.memory_space<vmem>>, vector<1x1x128xf32>
    %303 = vector.shape_cast %302 : vector<1x1x128xf32> to vector<1x128xf32>
    %c2_245 = arith.constant 2 : index
    %c2_246 = arith.constant 2 : index
    %c0_247 = arith.constant 0 : index
    %304 = vector.load %arg3[%c2_245, %c2_246, %c0_247] : memref<3x66x128xf32, #tpu.memory_space<vmem>>, vector<1x64x128xf32>
    %305 = vector.shape_cast %304 : vector<1x64x128xf32> to vector<64x128xf32>
    %306 = vector.broadcast %303 : vector<1x128xf32> to vector<64x128xf32>
    %307 = arith.mulf %306, %305 : vector<64x128xf32>
    %308 = arith.addf %301, %307 : vector<64x128xf32>
    %cst_248 = arith.constant 0.000000e+00 : f32
    %309 = vector.broadcast %cst_248 : f32 to vector<64x128xf32>
    %310 = arith.maximumf %308, %309 : vector<64x128xf32>
    %cst_249 = arith.constant 2.000000e+00 : f32
    %311 = vector.broadcast %cst_249 : f32 to vector<64x128xf32>
    %312 = arith.mulf %311, %310 : vector<64x128xf32>
    %c3_250 = arith.constant 3 : index
    %c0_251 = arith.constant 0 : index
    %c0_252 = arith.constant 0 : index
    %313 = vector.load %arg2[%c3_250, %c0_251, %c0_252] : memref<4x64x128xf32, #tpu.memory_space<vmem>>, vector<1x64x128xf32>
    %314 = vector.shape_cast %313 : vector<1x64x128xf32> to vector<64x128xf32>
    %315 = vector.shape_cast %312 : vector<64x128xf32> to vector<1x64x128xf32>
    tpu.vector_store %arg2[%c3_250, %c0_251, %c0_252], %315 {strides = array<i32>} : memref<4x64x128xf32, #tpu.memory_space<vmem>>, vector<1x64x128xf32>,
    return
  }
}

</mosaic_0001>

<bundles_post_ra>
// kernel: model_forward.1
= control target key start
LH: loop header
LB: loop body
LE: loop exit
PB: predicated region body
PF: predicated region fallthrough
CT: control target
= control target key end

     0   :  { %s1425_s13 = smov 1   ;;  %s1426_s26 = smov 127   ;;  %vm78_vm0 = vcmask 7168   ;;  %v1428_v26 = vmov 0.0   ;;  %vm111_vm1 = vcmask 515072   ;;  %vm152_vm2 = vcmask 523264   ;;  %s3198_s0 = inlined_call_operand.vmem [shape: f32[64,64], index: 0, kind: input, shape index: {}]   ;;  %s3199_s1 = inlined_call_operand.vmem [shape: f32[4,10,128], index: 1, kind: input, shape index: {}]   ;;  %s3200_s2 = inlined_call_operand.vmem [shape: f32[4,64,128], index: 2, kind: output, shape index: {}]  }
   0x1   :  { %v1447_v0 = vld [vmem:[%s3198_s0 + $0x10] sm:$0xff]  ;;  %v1452_v1 = vld [vmem:[%s3198_s0] sm:$0xff]  ;;  %v1465_v3 = vld [vmem:[%s3198_s0 + $0x18] sm:$0xff]  ;;  %22 = vst [vmem:[#allocation2 + $0x58] sm:$0xff] %v1428_v26 }
   0x2   :  { %58 = vrot.lane.b32.xlu1 %v1447_v0, %s1425_s13  ;;  %54 = vrot.lane.b32.xlu0 %v1452_v1, %s1425_s13  ;;  %v1459_v2 = vld [vmem:[%s3198_s0 + $0x20] sm:$0xff]  ;;  %v1470_v4 = vld [vmem:[%s3198_s0 + $0x8] sm:$0xff]  ;;  %23 = vst [vmem:[#allocation2 + $0x60] sm:$0xff] %v1428_v26 }
   0x3   :  { %62 = vrot.lane.b32.xlu2 %v1459_v2, %s1425_s13  ;;  %v1475_v5 = vld [vmem:[%s3198_s0 + $0x28] sm:$0xff]  ;;  %v1483_v6 = vld [vmem:[%s3198_s0 + $0x38] sm:$0xff]  ;;  %v1488_v7 = vld [vmem:[%s3198_s0 + $0x30] sm:$0xff]  ;;  %s1427_s0 = smov 64   ;;  %11 = vst [vmem:[#allocation2] sm:$0xff] %v1428_v26 }
   0x4   :  { %12 = vst [vmem:[#allocation2 + $0x8] sm:$0xff] %v1428_v26  ;;  %v1612_v52 = vld [vmem:[%s3199_s1 + $0x4] ss:$0 sm:$0xff]  ;;  %v1621_v54 = vld [vmem:[%s3199_s1 + $0x14] ss:$0 sm:$0xff] }
   0x5   :  { %13 = vst [vmem:[#allocation2 + $0x10] sm:$0xff] %v1428_v26  ;;  %v1626_v55 = vld [vmem:[%s3199_s1 + $0x24] ss:$0 sm:$0xff] }
   0x6   :  { %14 = vst [vmem:[#allocation2 + $0x18] sm:$0xff] %v1428_v26 }
   0x7   :  { %15 = vst [vmem:[#allocation2 + $0x20] sm:$0xff] %v1428_v26 }
   0x8   :  { %16 = vst [vmem:[#allocation2 + $0x28] sm:$0xff] %v1428_v26 }
   0x9   :  { %17 = vst [vmem:[#allocation2 + $0x30] sm:$0xff] %v1428_v26 }
   0xa   :  { %60 = vrot.lane.b32.xlu1 %v1465_v3, %s1425_s13  ;;  %56 = vrot.lane.b32.xlu0 %v1470_v4, %s1425_s13  ;;  %18 = vst [vmem:[#allocation2 + $0x38] sm:$0xff] %v1428_v26 }
   0xb   :  { %64 = vrot.lane.b32.xlu2 %v1475_v5, %s1425_s13  ;;  %19 = vst [vmem:[#allocation2 + $0x40] sm:$0x3] %v1428_v26 }
   0xc   :  { %20 = vst [vmem:[#allocation2 + $0x48] sm:$0xff] %v1428_v26 }
   0xd   :  { %21 = vst [vmem:[#allocation2 + $0x50] sm:$0xff] %v1428_v26 }
   0xe   :  { %24 = vst [vmem:[#allocation2 + $0x68] sm:$0xff] %v1428_v26 }
   0xf   :  { %25 = vst [vmem:[#allocation2 + $0x70] sm:$0xff] %v1428_v26 }
  0x10   :  { %26 = vst [vmem:[#allocation2 + $0x78] sm:$0xff] %v1428_v26 }
  0x11   :  { %27 = vst [vmem:[#allocation2 + $0x80] sm:$0xff] %v1428_v26 }
  0x12   :  { %68 = vrot.lane.b32.xlu1 %v1483_v6, %s1425_s13  ;;  %66 = vrot.lane.b32.xlu0 %v1488_v7, %s1425_s13  ;;  %28 = vst [vmem:[#allocation2 + $0x88] sm:$0x3] %v1428_v26 }
  0x13   :  { %87 = vrot.lane.b32.xlu2 %v1452_v1, %s1426_s26  ;;  %29 = vst [vmem:[#allocation2 + $0x90] sm:$0xff] %v1428_v26 }
  0x14   :  { %30 = vst [vmem:[#allocation2 + $0x98] sm:$0xff] %v1428_v26 }
  0x15   :  { %31 = vst [vmem:[#allocation2 + $0xa0] sm:$0xff] %v1428_v26 }
  0x16   :  { %32 = vst [vmem:[#allocation2 + $0xa8] sm:$0xff] %v1428_v26 }
  0x17   :  { %33 = vst [vmem:[#allocation2 + $0xb0] sm:$0xff] %v1428_v26 }
  0x18   :  { %34 = vst [vmem:[#allocation2 + $0xb8] sm:$0xff] %v1428_v26 }
  0x19   :  { %35 = vst [vmem:[#allocation2 + $0xc0] sm:$0xff] %v1428_v26 }
  0x1a   :  { %91 = vrot.lane.b32.xlu1 %v1447_v0, %s1426_s26  ;;  %89 = vrot.lane.b32.xlu0 %v1470_v4, %s1426_s26  ;;  %36 = vst [vmem:[#allocation2 + $0xc8] sm:$0xff] %v1428_v26 }
  0x1b   :  { %93 = vrot.lane.b32.xlu2 %v1465_v3, %s1426_s26  ;;  %37 = vst [vmem:[#allocation2 + $0xd0] sm:$0x3] %v1428_v26  ;;  %v1727_v26 = vld [vmem:[%s3199_s1 + $0x31] ss:$0 sm:$0xff] }
  0x22   :  { %97 = vrot.lane.b32.xlu1 %v1475_v5, %s1426_s26  ;;  %95 = vrot.lane.b32.xlu0 %v1459_v2, %s1426_s26 }
  0x23   :  { %99 = vrot.lane.b32.xlu2 %v1488_v7, %s1426_s26 }
  0x2a   :  { %101 = vrot.lane.b32.xlu0 %v1483_v6, %s1426_s26  ;;  %171 = vrot.lane.b32.xlu1 %v1470_v4, %s1427_s0 }
  0x2b   :  { %173 = vrot.lane.b32.xlu2 %v1447_v0, %s1427_s0 }
  0x32   :  { %169 = vrot.lane.b32.xlu0 %v1452_v1, %s1427_s0  ;;  %177 = vrot.lane.b32.xlu1 %v1459_v2, %s1427_s0 }
  0x33   :  { %179 = vrot.lane.b32.xlu2 %v1475_v5, %s1427_s0 }
  0x3a   :  { %175 = vrot.lane.b32.xlu0 %v1465_v3, %s1427_s0  ;;  %183 = vrot.lane.b32.xlu1 %v1483_v6, %s1427_s0 }
  0x42   :  { %181 = vrot.lane.b32.xlu0 %v1488_v7, %s1427_s0 }
  0x5d   :  { %v63_v8 = vpop.permute.xlu2 %62 }
  0x5e   :  { %v1545_v25 = vsel %vm78_vm0, 0.0, %v63_v8  ;;  %v1682_v8 = vld [vmem:[%s3199_s1 + $0x7] ss:$0 sm:$0xff] }
  0x65   :  { %v65_v9 = vpop.permute.xlu2 %64 }
  0x66   :  { %v1527_v15 = vsel %vm78_vm0, 0.0, %v65_v9  ;;  %v1687_v9 = vld [vmem:[%s3199_s1 + $0x11] ss:$0 sm:$0xff] }
  0x6d   :  { %v88_v14 = vpop.permute.xlu2 %87 }
  0x6e   :  { %v1572_v35 = vsel %vm111_vm1, %v88_v14, 0.0 }
  0x74   :  { %v59_v10 = vpop.permute.xlu1 %58  ;;  %v55_v11 = vpop.permute.xlu0 %54 }
  0x75   :  { %v1517_v12 = vsel %vm78_vm0, 0.0, %v59_v10  ;;  %v1520_v13 = vsel %vm78_vm0, 0.0, %v55_v11  ;;  %v94_v20 = vpop.permute.xlu2 %93  ;;  %v1692_v10 = vld [vmem:[%s3199_s1 + $0x17] ss:$0 sm:$0xff] }
  0x76   :  { %132 = vrot.lane.b32.xlu0 %v1517_v12, %s1427_s0  ;;  %128 = vrot.lane.b32.xlu1 %v1520_v13, %s1427_s0  ;;  %v1587_v39 = vsel %vm111_vm1, %v94_v20, 0.0 }
  0x7c   :  { %v61_v16 = vpop.permute.xlu1 %60  ;;  %v57_v17 = vpop.permute.xlu0 %56 }
  0x7d   :  { %v1530_v18 = vsel %vm78_vm0, 0.0, %v61_v16  ;;  %v1533_v19 = vsel %vm78_vm0, 0.0, %v57_v17  ;;  %v100_v24 = vpop.permute.xlu2 %99  ;;  %v1704_v16 = vld [vmem:[%s3199_s1 + $0x21] ss:$0 sm:$0xff]  ;;  %v1709_v17 = vld [vmem:[%s3199_s1 + $0x27] ss:$0 sm:$0xff] }
  0x7e   :  { %138 = vrot.lane.b32.xlu0 %v1527_v15, %s1427_s0  ;;  %134 = vrot.lane.b32.xlu1 %v1530_v18, %s1427_s0  ;;  %v1601_v46 = vsel %vm111_vm1, %v100_v24, 0.0 }
  0x7f   :  { %130 = vrot.lane.b32.xlu2 %v1533_v19, %s1427_s0 }
  0x84   :  { %v69_v21 = vpop.permute.xlu1 %68  ;;  %v67_v22 = vpop.permute.xlu0 %66 }
  0x85   :  { %v1542_v23 = vsel %vm78_vm0, 0.0, %v67_v22  ;;  %v1552_v27 = vsel %vm78_vm0, 0.0, %v69_v21  ;;  %v174_v32 = vpop.permute.xlu2 %173 }
  0x86   :  { %140 = vrot.lane.b32.xlu1 %v1542_v23, %s1427_s0  ;;  %v1566_v33 = vsel %vm152_vm2, %v1447_v0, %v174_v32 }
  0x87   :  { %136 = vrot.lane.b32.xlu2 %v1545_v25, %s1427_s0  ;;  %204 = vst [vmem:[#allocation2 + $0x59] sm:$0xff] %v1566_v33 }
  0x8c   :  { %v92_v28 = vpop.permute.xlu1 %91  ;;  %v90_v29 = vpop.permute.xlu0 %89 }
  0x8d   :  { %v1555_v30 = vsel %vm111_vm1, %v92_v28, 0.0  ;;  %v1558_v31 = vsel %vm111_vm1, %v90_v29, 0.0  ;;  %v180_v44 = vpop.permute.xlu2 %179  ;;  %v1732_v28 = vld [vmem:[%s3199_s1 + $0x37] ss:$0 sm:$0xff] }
  0x8e   :  { %3217 = vst [vmem:[#allocation3_spill] sm:$0xff] %v1558_v31  ;;  %222 = vrot.lane.b32.xlu1 %v1555_v30, %s1427_s0  ;;  %220 = vrot.lane.b32.xlu0 %v1558_v31, %s1427_s0  ;;  %v198_v45 = vsel %vm152_vm2, %v1475_v5, %v180_v44 }
  0x8f   :  { %142 = vrot.lane.b32.xlu2 %v1552_v27, %s1427_s0  ;;  %207 = vst [vmem:[#allocation2 + $0x71] sm:$0xff] %v198_v45  ;;  %v1695_v11 = vmul.f32 %v1612_v52, %v198_v45  ;;  %v1715_v22 = vmul.f32 %v1621_v54, %v198_v45 }
  0x91   :  { %3230 = vst [vmem:[#allocation16_spill] sm:$0xff] %v1695_v11 }
  0x92   :  { %3232 = vst [vmem:[#allocation18_spill] sm:$0xff] %v1715_v22 }
  0x94   :  { %v98_v34 = vpop.permute.xlu1 %97  ;;  %v96_v36 = vpop.permute.xlu0 %95 }
  0x95   :  { %v1575_v37 = vsel %vm111_vm1, %v98_v34, 0.0  ;;  %v1578_v38 = vsel %vm111_vm1, %v96_v36, 0.0 }
  0x96   :  { %3218 = vst [vmem:[#allocation4_spill] sm:$0xff] %v1575_v37  ;;  %228 = vrot.lane.b32.xlu1 %v1575_v37, %s1427_s0  ;;  %226 = vrot.lane.b32.xlu0 %v1578_v38, %s1427_s0 }
  0x97   :  { %3219 = vst [vmem:[#allocation5_spill] sm:$0xff] %v1578_v38  ;;  %218 = vrot.lane.b32.xlu2 %v1572_v35, %s1427_s0 }
  0x9c   :  { %v102_v40 = vpop.permute.xlu0 %101  ;;  %v172_v41 = vpop.permute.xlu1 %171 }
  0x9d   :  { %v1590_v42 = vsel %vm111_vm1, %v102_v40, 0.0  ;;  %v194_v43 = vsel %vm152_vm2, %v1470_v4, %v172_v41  ;;  %v1669_v4 = vld [vmem:[%s3199_s1 + $0x1] ss:$0 sm:$0xff] }
  0x9e   :  { %3220 = vst [vmem:[#allocation6_spill] sm:$0xff] %v1590_v42  ;;  %232 = vrot.lane.b32.xlu0 %v1590_v42, %s1427_s0  ;;  %v1712_v21 = vmul.f32 %v1612_v52, %v194_v43  ;;  %v1735_v32 = vmul.f32 %v1621_v54, %v194_v43 }
  0x9f   :  { %224 = vrot.lane.b32.xlu2 %v1587_v39, %s1427_s0  ;;  %203 = vst [vmem:[#allocation2 + $0x51] sm:$0xff] %v194_v43 }
  0xa0   :  { %3231 = vst [vmem:[#allocation17_spill] sm:$0xff] %v1712_v21 }
  0xa1   :  { %3235 = vst [vmem:[#allocation21_spill] sm:$0xff] %v1735_v32 }
  0xa4   :  { %v170_v47 = vpop.permute.xlu0 %169  ;;  %v178_v48 = vpop.permute.xlu1 %177 }
  0xa5   :  { %v193_v49 = vsel %vm152_vm2, %v1452_v1, %v170_v47  ;;  %v197_v50 = vsel %vm152_vm2, %v1459_v2, %v178_v48  ;;  %v1656_v1 = vld [vmem:[%s3199_s1 + $0x34] ss:$0 sm:$0xff]  ;;  %v1660_v2 = vmul.f32 %v1612_v52, %v1566_v33 }
  0xa6   :  { %202 = vst [vmem:[#allocation2 + $0x49] sm:$0xff] %v193_v49  ;;  %v290_v20 = vld [vmem:[#allocation2 + $0x58] sm:$0xff]  ;;  %v1721_v24 = vmul.f32 %v1656_v1, %v198_v45  ;;  %v1741_v34 = vmul.f32 %v1656_v1, %v194_v43  ;;  %v1744_v36 = vmul.f32 %v1612_v52, %v193_v49  ;;  %v1747_v41 = vmul.f32 %v1621_v54, %v193_v49 }
  0xa7   :  { %230 = vrot.lane.b32.xlu2 %v1601_v46, %s1427_s0  ;;  %206 = vst [vmem:[#allocation2 + $0x69] sm:$0xff] %v197_v50  ;;  %v445_v29 = vld [vmem:[#allocation2 + $0x52] sm:$0xff]  ;;  %v1750_v44 = vmul.f32 %v1626_v55, %v193_v49  ;;  %v1756_v47 = vmul.f32 %v1612_v52, %v197_v50  ;;  %v1759_v48 = vmul.f32 %v1669_v4, %v290_v20 }
  0xa8   :  { %3226 = vst [vmem:[#allocation12_spill] sm:$0xff] %v1660_v2  ;;  %v1786_v42 = vmul.f32 %v1727_v26, %v290_v20 }
  0xa9   :  { %3234 = vst [vmem:[#allocation20_spill] sm:$0xff] %v1721_v24 }
  0xaa   :  { %3237 = vst [vmem:[#allocation23_spill] sm:$0xff] %v1741_v34 }
  0xab   :  { %3238 = vst [vmem:[#allocation24_spill] sm:$0xff] %v1756_v47 }
  0xac   :  { %v176_v51 = vpop.permute.xlu0 %175  ;;  %v184_v56 = vpop.permute.xlu1 %183  ;;  %3239 = vst [vmem:[#allocation25_spill] sm:$0xff] %v1759_v48 }
  0xad   :  { %v1616_v53 = vsel %vm152_vm2, %v1465_v3, %v176_v51  ;;  %v200_v57 = vsel %vm152_vm2, %v1483_v6, %v184_v56  ;;  %v1664_v3 = vmul.f32 %v1621_v54, %v1566_v33  ;;  %v1673_v6 = vmul.f32 %v1626_v55, %v1566_v33  ;;  %v288_v40 = vld [vmem:[#allocation2 + $0x48] sm:$0xff]  ;;  %3248 = vst [vmem:[#allocation34_spill] sm:$0xff] %v1786_v42 }
  0xae   :  { %205 = vst [vmem:[#allocation2 + $0x61] sm:$0xff] %v1616_v53  ;;  %v1632_v58 = vmul.f32 %v1612_v52, %v200_v57  ;;  %v1635_v59 = vmul.f32 %v1621_v54, %v200_v57  ;;  %v1638_v60 = vmul.f32 %v1626_v55, %v200_v57  ;;  %v444_v51 = vld [vmem:[#allocation2 + $0x4a] sm:$0xff]  ;;  %v1762_v56 = vmul.f32 %v1621_v54, %v197_v50 }
  0xaf   :  { %209 = vst [vmem:[#allocation2 + $0x81] sm:$0xff] %v200_v57  ;;  %v1765_v57 = vmul.f32 %v1626_v55, %v197_v50  ;;  %v1792_v24 = vmul.f32 %v1669_v4, %v288_v40  ;;  %v1810_v47 = vmul.f32 %v1704_v16, %v288_v40  ;;  %v1858_v2 = vmul.f32 %v1612_v52, %v1616_v53 }
  0xb0   :  { %3221 = vst [vmem:[#allocation7_spill] sm:$0xff] %v1632_v58  ;;  %v1783_v58 = vmul.f32 %v1709_v17, %v445_v29  ;;  %v1866_v21 = vmul.f32 %v1626_v55, %v1616_v53 }
  0xb1   :  { %3222 = vst [vmem:[#allocation8_spill] sm:$0xff] %v1635_v59  ;;  %v1780_v59 = vmul.f32 %v1704_v16, %v290_v20 }
  0xb2   :  { %3223 = vst [vmem:[#allocation9_spill] sm:$0xff] %v1638_v60  ;;  %v1777_v60 = vmul.f32 %v1692_v10, %v445_v29 }
  0xb3   :  { %3227 = vst [vmem:[#allocation13_spill] sm:$0xff] %v1664_v3 }
  0xb4   :  { %v182_v61 = vpop.permute.xlu0 %181  ;;  %3228 = vst [vmem:[#allocation14_spill] sm:$0xff] %v1673_v6 }
  0xb5   :  { %v1642_v62 = vsel %vm152_vm2, %v1488_v7, %v182_v61  ;;  %v1677_v7 = vmul.f32 %v1656_v1, %v1566_v33  ;;  %v1738_v33 = vmul.f32 %v1626_v55, %v194_v43  ;;  %v289_v43 = vld [vmem:[#allocation2 + $0x50] sm:$0xff]  ;;  %3240 = vst [vmem:[#allocation26_spill] sm:$0xff] %v1762_v56  ;;  %v1768_v61 = vmul.f32 %v1656_v1, %v197_v50  ;;  %v446_v6 = vld [vmem:[#allocation2 + $0x5a] sm:$0xff]  ;;  %v447_v32 = vld [vmem:[#allocation2 + $0x62] sm:$0xff] }
  0xb6   :  { %208 = vst [vmem:[#allocation2 + $0x79] sm:$0xff] %v1642_v62  ;;  %v1647_v63 = vmul.f32 %v1612_v52, %v1642_v62  ;;  %v1651_v0 = vmul.f32 %v1621_v54, %v1642_v62  ;;  %v1789_v50 = vmul.f32 %v1732_v28, %v445_v29  ;;  %v1804_v22 = vmul.f32 %v1687_v9, %v289_v43  ;;  %v448_v56 = vld [vmem:[#allocation2 + $0x6a] sm:$0xff] }
  0xb7   :  { %3229 = vst [vmem:[#allocation15_spill] sm:$0xff] %v1677_v7  ;;  %v1823_v7 = vmul.f32 %v1727_v26, %v288_v40  ;;  %v1826_v34 = vmul.f32 %v1727_v26, %v289_v43  ;;  %v1879_v52 = vmul.f32 %v1682_v8, %v446_v6  ;;  %v1894_v38 = vmul.f32 %v1692_v10, %v447_v32 }
  0xb8   :  { %3224 = vst [vmem:[#allocation10_spill] sm:$0xff] %v1647_v63  ;;  %v1926_v42 = vmul.f32 %v1709_v17, %v446_v6 }
  0xb9   :  { %3225 = vst [vmem:[#allocation11_spill] sm:$0xff] %v1651_v0  ;;  %v1813_v0 = vmul.f32 %v1704_v16, %v289_v43 }
  0xba   :  { %3236 = vst [vmem:[#allocation22_spill] sm:$0xff] %v1738_v33  ;;  %v1848_v33 = vmul.f32 %v1709_v17, %v448_v56 }
  0xbb   :  { %3241 = vst [vmem:[#allocation27_spill] sm:$0xff] %v1765_v57  ;;  %v1801_v57 = vmul.f32 %v1687_v9, %v288_v40  ;;  %v1842_v40 = vmul.f32 %v1692_v10, %v448_v56 }
  0xbc   :  { %3242 = vst [vmem:[#allocation28_spill] sm:$0xff] %v1768_v61  ;;  %v1795_v61 = vmul.f32 %v1669_v4, %v289_v43  ;;  %v292_v43 = vld [vmem:[#allocation2 + $0x68] sm:$0xff] }
  0xbd   :  { %3245 = vst [vmem:[#allocation31_spill] sm:$0xff] %v1777_v60  ;;  %v294_v31 = vld [vmem:[#allocation2 + $0x78] sm:$0xff] }
  0xbe   :  { %3246 = vst [vmem:[#allocation32_spill] sm:$0xff] %v1780_v59  ;;  %v2144_v59 = vld [vmem:[%s3199_s1 + $0x36] ss:$0 sm:$0xff] }
  0xbf   :  { %3247 = vst [vmem:[#allocation33_spill] sm:$0xff] %v1783_v58  ;;  %v1829_v58 = vmul.f32 %v1732_v28, %v444_v51 }
  0xc0   :  { %3249 = vst [vmem:[#allocation35_spill] sm:$0xff] %v1789_v50  ;;  %v1820_v50 = vmul.f32 %v1709_v17, %v444_v51 }
  0xc1   :  { %3250 = vst [vmem:[#allocation36_spill] sm:$0xff] %v1795_v61 }
  0xc2   :  { %3252 = vst [vmem:[#allocation38_spill] sm:$0xff] %v1804_v22 }
  0xc3   :  { %3254 = vst [vmem:[#allocation40_spill] sm:$0xff] %v1813_v0 }
  0xc4   :  { %3255 = vst [vmem:[#allocation41_spill] sm:$0xff] %v1820_v50 }
  0xc5   :  { %3256 = vst [vmem:[#allocation42_spill] sm:$0xff] %v1826_v34  ;;  %v1929_v34 = vmul.f32 %v1709_v17, %v447_v32 }
  0xc6   :  { %3257 = vst [vmem:[#allocation43_spill] sm:$0xff] %v1829_v58 }
  0xc7   :  { %3261 = vst [vmem:[#allocation47_spill] sm:$0xff] %v1842_v40  ;;  %v1862_v40 = vmul.f32 %v1621_v54, %v1616_v53 }
  0xc8   :  { %3263 = vst [vmem:[#allocation49_spill] sm:$0xff] %v1848_v33  ;;  %v1885_v33 = vmul.f32 %v1682_v8, %v447_v32 }
  0xc9   :  { %3266 = vst [vmem:[#allocation52_spill] sm:$0xff] %v1858_v2 }
  0xca   :  { %3267 = vst [vmem:[#allocation53_spill] sm:$0xff] %v1862_v40 }
  0xcb   :  { %3268 = vst [vmem:[#allocation54_spill] sm:$0xff] %v1866_v21 }
  0xcc   :  { %3271 = vst [vmem:[#allocation57_spill] sm:$0xff] %v1879_v52  ;;  %v1899_v52 = vld [vmem:[%s3199_s1 + $0x3] ss:$0 sm:$0xff] }
  0xcd   :  { %3272 = vst [vmem:[#allocation58_spill] sm:$0xff] %v1885_v33  ;;  %v1904_v33 = vld [vmem:[%s3199_s1 + $0x13] ss:$0 sm:$0xff] }
  0xce   :  { %3275 = vst [vmem:[#allocation61_spill] sm:$0xff] %v1894_v38  ;;  %v1915_v38 = vmul.f32 %v1704_v16, %v292_v43 }
  0xcf   :  { %3277 = vst [vmem:[#allocation63_spill] sm:$0xff] %v1926_v42  ;;  %v450_v42 = vld [vmem:[#allocation2 + $0x7a] sm:$0xff] }
  0xd0   :  { %3276 = vst [vmem:[#allocation62_spill] sm:$0xff] %v1915_v38  ;;  %v1935_v38 = vmul.f32 %v1727_v26, %v292_v43 }
  0xd1   :  { %3278 = vst [vmem:[#allocation64_spill] sm:$0xff] %v1929_v34  ;;  %v1946_v34 = vmul.f32 %v1626_v55, %v1642_v62 }
  0xd2   :  { %3280 = vst [vmem:[#allocation66_spill] sm:$0xff] %v1935_v38 }
  0xd3   :  { %3283 = vst [vmem:[#allocation69_spill] sm:$0xff] %v1946_v34 }
  0xd9   :  { %v131_v5 = vpop.permute.xlu2 %130 }
  0xda   :  { %v1699_v14 = vsel %vm152_vm2, %v1533_v19, %v131_v5  ;;  %v1718_v19 = vmul.f32 %v1626_v55, %v198_v45  ;;  %v1753_v45 = vmul.f32 %v1656_v1, %v193_v49  ;;  %v1771_v49 = vmul.f32 %v1682_v8, %v445_v29 }
  0xdb   :  { %162 = vst [vmem:[#allocation2 + $0x9] sm:$0xff] %v1699_v14  ;;  %v1774_v5 = vmul.f32 %v1687_v9, %v290_v20  ;;  %v293_v20 = vld [vmem:[#allocation2 + $0x70] sm:$0xff]  ;;  %v1807_v29 = vmul.f32 %v1692_v10, %v444_v51  ;;  %v1970_v55 = vmul.f32 %v1669_v4, %v294_v31 }
  0xdc   :  { %3233 = vst [vmem:[#allocation19_spill] sm:$0xff] %v1718_v19  ;;  %v1798_v19 = vmul.f32 %v1682_v8, %v444_v51  ;;  %v1833_v60 = vmul.f32 %v1669_v4, %v293_v20  ;;  %v1845_v51 = vmul.f32 %v1704_v16, %v293_v20  ;;  %v1851_v3 = vmul.f32 %v1727_v26, %v293_v20 }
  0xdd   :  { %3243 = vst [vmem:[#allocation29_spill] sm:$0xff] %v1771_v49  ;;  %v291_v49 = vld [vmem:[#allocation2 + $0x60] sm:$0xff] }
  0xde   :  { %3244 = vst [vmem:[#allocation30_spill] sm:$0xff] %v1774_v5  ;;  %v1882_v54 = vmul.f32 %v1687_v9, %v291_v49  ;;  %v1932_v37 = vmul.f32 %v1727_v26, %v291_v49 }
  0xdf   :  { %3251 = vst [vmem:[#allocation37_spill] sm:$0xff] %v1798_v19 }
  0xe0   :  { %3253 = vst [vmem:[#allocation39_spill] sm:$0xff] %v1807_v29 }
  0xe1   :  { %v137_v11 = vpop.permute.xlu2 %136  ;;  %3258 = vst [vmem:[#allocation44_spill] sm:$0xff] %v1833_v60 }
  0xe2   :  { %v1817_v63 = vsel %vm152_vm2, %v1545_v25, %v137_v11  ;;  %v1836_v25 = vmul.f32 %v1682_v8, %v448_v56  ;;  %v1839_v11 = vmul.f32 %v1687_v9, %v293_v20  ;;  %3262 = vst [vmem:[#allocation48_spill] sm:$0xff] %v1845_v51  ;;  %v1870_v20 = vmul.f32 %v1656_v1, %v1616_v53 }
  0xe3   :  { %165 = vst [vmem:[#allocation2 + $0x21] sm:$0xff] %v1817_v63  ;;  %v1891_v53 = vmul.f32 %v1692_v10, %v446_v6 }
  0xe4   :  { %3259 = vst [vmem:[#allocation45_spill] sm:$0xff] %v1836_v25  ;;  %v1854_v25 = vmul.f32 %v1732_v28, %v448_v56  ;;  %v1873_v56 = vmul.f32 %v1669_v4, %v291_v49 }
  0xe5   :  { %3260 = vst [vmem:[#allocation46_spill] sm:$0xff] %v1839_v11 }
  0xe6   :  { %3264 = vst [vmem:[#allocation50_spill] sm:$0xff] %v1851_v3  ;;  %v1888_v3 = vmul.f32 %v1687_v9, %v292_v43 }
  0xe7   :  { %3265 = vst [vmem:[#allocation51_spill] sm:$0xff] %v1854_v25  ;;  %v1876_v25 = vmul.f32 %v1669_v4, %v292_v43  ;;  %v1953_v43 = vmul.f32 %v1656_v1, %v1642_v62 }
  0xe8   :  { %3269 = vst [vmem:[#allocation55_spill] sm:$0xff] %v1870_v20  ;;  %v129_v51 = vpop.permute.xlu1 %128  ;;  %v133_v11 = vpop.permute.xlu0 %132 }
  0xe9   :  { %3270 = vst [vmem:[#allocation56_spill] sm:$0xff] %v1876_v25  ;;  %v1919_v60 = vsel %vm152_vm2, %v1520_v13, %v129_v51  ;;  %v143_v25 = vpop.permute.xlu2 %142  ;;  %v1923_v58 = vsel %vm152_vm2, %v1517_v12, %v133_v11  ;;  %v295_v13 = vld [vmem:[#allocation2 + $0x80] sm:$0xff]  ;;  %v449_v51 = vld [vmem:[#allocation2 + $0x72] sm:$0xff]  ;;  %v1939_v12 = vmul.f32 %v1732_v28, %v446_v6  ;;  %v1942_v11 = vmul.f32 %v1732_v28, %v447_v32 }
  0xea   :  { %3273 = vst [vmem:[#allocation59_spill] sm:$0xff] %v1888_v3  ;;  %v1909_v3 = vld [vmem:[%s3199_s1 + $0x23] ss:$0 sm:$0xff]  ;;  %v1973_v62 = vmul.f32 %v1669_v4, %v295_v13  ;;  %v1976_v1 = vmul.f32 %v1682_v8, %v449_v51  ;;  %v1994_v4 = vmul.f32 %v1704_v16, %v294_v31  ;;  %v2130_v50 = vmul.f32 %v1904_v33, %v1923_v58 }
  0xeb   :  { %3274 = vst [vmem:[#allocation60_spill] sm:$0xff] %v1891_v53  ;;  %v1912_v53 = vmul.f32 %v1704_v16, %v291_v49  ;;  %v160_v49 = vsel %vm152_vm2, %v1552_v27, %v143_v25  ;;  %v1967_v27 = vld [vmem:[%s3199_s1 + $0x33] ss:$0 sm:$0xff]  ;;  %v1979_v25 = vmul.f32 %v1687_v9, %v294_v31  ;;  %v2098_v34 = vmul.f32 %v1909_v3, %v1919_v60 }
  0xec   :  { %3279 = vst [vmem:[#allocation65_spill] sm:$0xff] %v1932_v37  ;;  %v1956_v6 = vmul.f32 %v1899_v52, %v160_v49  ;;  %v1959_v32 = vmul.f32 %v1904_v33, %v160_v49 }
  0xed   :  { %161 = vst [vmem:[#allocation2 + $0x1] sm:$0xff] %v1919_v60 }
  0xee   :  { %3281 = vst [vmem:[#allocation67_spill] sm:$0xff] %v1939_v12  ;;  %v2104_v12 = vld [vmem:[%s3199_s1 + $0x19] ss:$0 sm:$0xff] }
  0xef   :  { %3282 = vst [vmem:[#allocation68_spill] sm:$0xff] %v1942_v11  ;;  %v1962_v11 = vmul.f32 %v1909_v3, %v160_v49 }
  0xf0   :  { %163 = vst [vmem:[#allocation2 + $0x11] sm:$0xff] %v1923_v58 }
  0xf1   :  { %3284 = vst [vmem:[#allocation70_spill] sm:$0xff] %v1953_v43  ;;  %v2094_v43 = vmul.f32 %v1904_v33, %v1919_v60 }
  0xf2   :  { %168 = vst [vmem:[#allocation2 + $0x39] sm:$0xff] %v160_v49  ;;  %v1982_v49 = vmul.f32 %v1682_v8, %v450_v42  ;;  %v2003_v8 = vmul.f32 %v1727_v26, %v294_v31  ;;  %v2023_v31 = vmul.f32 %v1732_v28, %v449_v51  ;;  %v135_v26 = vpop.permute.xlu1 %134  ;;  %v2041_v28 = vld [vmem:[%s3199_s1 + $0x20] ss:$0 sm:$0xff] }
  0xf3   :  { %3285 = vst [vmem:[#allocation71_spill] sm:$0xff] %v1956_v6  ;;  %v1991_v6 = vmul.f32 %v1692_v10, %v450_v42  ;;  %v2012_v42 = vmul.f32 %v1899_v52, %v1699_v14 }
  0xf4   :  { %3286 = vst [vmem:[#allocation72_spill] sm:$0xff] %v1959_v32  ;;  %v1988_v32 = vmul.f32 %v1692_v10, %v449_v51  ;;  %v2016_v10 = vmul.f32 %v1904_v33, %v1699_v14 }
  0xf5   :  { %3287 = vst [vmem:[#allocation73_spill] sm:$0xff] %v1962_v11  ;;  %v1985_v11 = vmul.f32 %v1687_v9, %v295_v13  ;;  %v2008_v9 = vld [vmem:[%s3199_s1] ss:$0 sm:$0xff] }
  0xf6   :  { %3288 = vst [vmem:[#allocation74_spill] sm:$0xff] %v1970_v55 }
  0xf7   :  { %3289 = vst [vmem:[#allocation75_spill] sm:$0xff] %v1973_v62  ;;  %v1997_v62 = vmul.f32 %v1704_v16, %v295_v13  ;;  %v2020_v16 = vmul.f32 %v1909_v3, %v1699_v14  ;;  %v139_v13 = vpop.permute.xlu0 %138  ;;  %v264_v38 = vld [vmem:[#allocation2 + $0x10] sm:$0xff] }
  0xf8   :  { %3290 = vst [vmem:[#allocation76_spill] sm:$0xff] %v1976_v1  ;;  %v2000_v1 = vmul.f32 %v1709_v17, %v449_v51  ;;  %v2028_v17 = vld [vmem:[%s3199_s1 + $0x10] ss:$0 sm:$0xff]  ;;  %v262_v51 = vld [vmem:[#allocation2] sm:$0xff]  ;;  %v273_v22 = vmul.f32 %v2008_v9, %v264_v38  ;;  %v796_v19 = vmul.f32 %v2041_v28, %v264_v38 }
  0xf9   :  { %3291 = vst [vmem:[#allocation77_spill] sm:$0xff] %v1979_v25  ;;  %v794_v25 = vmul.f32 %v2041_v28, %v262_v51 }
  0xfa   :  { %3292 = vst [vmem:[#allocation78_spill] sm:$0xff] %v1982_v49  ;;  %v2036_v49 = vmul.f32 %v1899_v52, %v1817_v63 }
  0xfb   :  { %3293 = vst [vmem:[#allocation79_spill] sm:$0xff] %v1985_v11  ;;  %v2047_v11 = vpop.permute.xlu2 %218 }
  0xfc   :  { %3294 = vst [vmem:[#allocation80_spill] sm:$0xff] %v1988_v32  ;;  %v2059_v32 = vmul.f32 %v1909_v3, %v1817_v63 }
  0xfd   :  { %3295 = vst [vmem:[#allocation81_spill] sm:$0xff] %v1991_v6  ;;  %v2032_v6 = vmul.f32 %v1967_v27, %v1699_v14  ;;  %v2051_v14 = vsel %vm152_vm2, %v1527_v15, %v139_v13  ;;  %v2073_v15 = vld [vmem:[%s3199_s1 + $0x30] ss:$0 sm:$0xff]  ;;  %v2088_v13 = vld [vmem:[%s3199_s1 + $0x16] ss:$0 sm:$0xff] }
  0xfe   :  { %3296 = vst [vmem:[#allocation82_spill] sm:$0xff] %v1994_v4  ;;  %v2124_v4 = vld [vmem:[%s3199_s1 + $0x29] ss:$0 sm:$0xff]  ;;  %v1056_v20 = vmul.f32 %v2073_v15, %v262_v51  ;;  %v2358_v37 = vmul.f32 %v1899_v52, %v2051_v14 }
  0xff   :  { %3297 = vst [vmem:[#allocation83_spill] sm:$0xff] %v1997_v62  ;;  %v2045_v62 = vsel %vm152_vm2, %v1530_v18, %v135_v26  ;;  %v2068_v18 = vld [vmem:[%s3199_s1 + $0x6] ss:$0 sm:$0xff]  ;;  %v2077_v26 = vmul.f32 %v1899_v52, %v1919_v60 }
 0x100   :  { %3298 = vst [vmem:[#allocation84_spill] sm:$0xff] %v2000_v1  ;;  %v2055_v1 = vmul.f32 %v1904_v33, %v1817_v63 }
 0x101   :  { %3299 = vst [vmem:[#allocation85_spill] sm:$0xff] %v2003_v8  ;;  %v2119_v8 = vmul.f32 %v1899_v52, %v1923_v58 }
 0x102   :  { %3300 = vst [vmem:[#allocation86_spill] sm:$0xff] %v2012_v42  ;;  %v2115_v42 = vmul.f32 %v1967_v27, %v1919_v60  ;;  %v2134_v60 = vmul.f32 %v1909_v3, %v1923_v58 }
 0x103   :  { %3301 = vst [vmem:[#allocation87_spill] sm:$0xff] %v2016_v10 }
 0x104   :  { %3302 = vst [vmem:[#allocation88_spill] sm:$0xff] %v2020_v16  ;;  %v532_v16 = vmul.f32 %v2028_v17, %v262_v51 }
 0x105   :  { %3303 = vst [vmem:[#allocation89_spill] sm:$0xff] %v2023_v31  ;;  %v263_v31 = vld [vmem:[#allocation2 + $0x8] sm:$0xff] }
 0x106   :  { %3304 = vst [vmem:[#allocation90_spill] sm:$0xff] %v2028_v17  ;;  %v533_v10 = vmul.f32 %v2028_v17, %v263_v31  ;;  %v795_v55 = vmul.f32 %v2041_v28, %v263_v31  ;;  %v2166_v40 = vadd.f32 %v2104_v12, %v532_v16  ;;  %v1058_v16 = vmul.f32 %v2073_v15, %v264_v38 }
 0x107   :  { %3305 = vst [vmem:[#allocation91_spill] sm:$0xff] %v2032_v6  ;;  %v2109_v6 = vld [vmem:[%s3199_s1 + $0x26] ss:$0 sm:$0xff] }
 0x108   :  { %3306 = vst [vmem:[#allocation92_spill] sm:$0xff] %v2036_v49  ;;  %v2063_v49 = vmul.f32 %v1967_v27, %v1817_v63  ;;  %v2083_v63 = vld [vmem:[%s3199_s1 + $0x9] ss:$0 sm:$0xff] }
 0x109   :  { %3307 = vst [vmem:[#allocation93_spill] sm:$0xff] %v2041_v28 }
 0x10a   :  { %3308 = vst [vmem:[#allocation94_spill] sm:$0xff] %v2055_v1  ;;  %v418_v1 = vld [vmem:[#allocation2 + $0x2] sm:$0xff] }
 0x10b   :  { %3309 = vst [vmem:[#allocation95_spill] sm:$0xff] %v2059_v32  ;;  %v272_v32 = vmul.f32 %v2008_v9, %v263_v31  ;;  %v2147_v0 = vmul.f32 %v2068_v18, %v418_v1  ;;  %v2162_v5 = vmul.f32 %v2088_v13, %v418_v1  ;;  %v2190_v61 = vmul.f32 %v2144_v59, %v418_v1 }
 0x10c   :  { %3310 = vst [vmem:[#allocation96_spill] sm:$0xff] %v2063_v49  ;;  %v271_v49 = vmul.f32 %v2008_v9, %v262_v51  ;;  %v419_v51 = vld [vmem:[#allocation2 + $0xa] sm:$0xff] }
 0x10d   :  { %164 = vst [vmem:[#allocation2 + $0x19] sm:$0xff] %v2045_v62  ;;  %v2159_v29 = vadd.f32 %v2083_v63, %v272_v32  ;;  %v2176_v32 = vadd.f32 %v2124_v4, %v794_v25 }
 0x10e   :  { %166 = vst [vmem:[#allocation2 + $0x29] sm:$0xff] %v2051_v14  ;;  %v2156_v21 = vadd.f32 %v2083_v63, %v271_v49  ;;  %v534_v49 = vmul.f32 %v2028_v17, %v264_v38  ;;  %v2200_v38 = vmul.f32 %v2088_v13, %v419_v51 }
 0x10f   :  { %3311 = vst [vmem:[#allocation97_spill] sm:$0xff] %v2119_v8  ;;  %v2139_v8 = vld [vmem:[%s3199_s1 + $0x39] ss:$0 sm:$0xff] }
 0x110   :  { %3312 = vst [vmem:[#allocation98_spill] sm:$0xff] %v2130_v50  ;;  %v1057_v50 = vmul.f32 %v2073_v15, %v263_v31  ;;  %v2169_v31 = vadd.f32 %v2104_v12, %v533_v10  ;;  %v2184_v10 = vadd.f32 %v2139_v8, %v1056_v20 }
 0x111   :  { %3313 = vst [vmem:[#allocation99_spill] sm:$0xff] %v2134_v60  ;;  %v2153_v60 = vmul.f32 %v1967_v27, %v1923_v58  ;;  %v2172_v58 = vmul.f32 %v2109_v6, %v418_v1  ;;  %v2209_v1 = vmul.f32 %v2109_v6, %v419_v51 }
 0x112   :  { %3314 = vst [vmem:[#allocation100_spill] sm:$0xff] %v2147_v0 }
 0x113   :  { %3315 = vst [vmem:[#allocation101_spill] sm:$0xff] %v2153_v60  ;;  %v2179_v60 = vadd.f32 %v2124_v4, %v795_v55  ;;  %v2194_v55 = vadd.f32 %v2083_v63, %v273_v22  ;;  %v2212_v22 = vmul.f32 %v2144_v59, %v419_v51 }
 0x114   :  { %3316 = vst [vmem:[#allocation102_spill] sm:$0xff] %v2159_v29  ;;  %v265_v2 = vld [vmem:[#allocation2 + $0x18] sm:$0xff]  ;;  %v266_v48 = vld [vmem:[#allocation2 + $0x20] sm:$0xff] }
 0x115   :  { %3317 = vst [vmem:[#allocation103_spill] sm:$0xff] %v2162_v5  ;;  %v274_v25 = vmul.f32 %v2008_v9, %v265_v2  ;;  %v275_v20 = vmul.f32 %v2008_v9, %v266_v48  ;;  %v420_v29 = vld [vmem:[#allocation2 + $0x12] sm:$0xff]  ;;  %v566_v5 = vadd.f32 %v1801_v57, %v2166_v40  ;;  %v422_v0 = vld [vmem:[#allocation2 + $0x22] sm:$0xff] }
 0x116   :  { %3318 = vst [vmem:[#allocation104_spill] sm:$0xff] %v2169_v31  ;;  %v2187_v31 = vadd.f32 %v2139_v8, %v1057_v50  ;;  %v2206_v50 = vadd.f32 %v2104_v12, %v534_v49  ;;  %v536_v49 = vmul.f32 %v2028_v17, %v266_v48  ;;  %v2336_v57 = vld [vmem:[%s3199_s1 + $0x12] ss:$0 sm:$0xff]  ;;  %v2341_v40 = vld [vmem:[%s3199_s1 + $0x22] ss:$0 sm:$0xff] }
 0x117   :  { %3319 = vst [vmem:[#allocation105_spill] sm:$0xff] %v2172_v58  ;;  %v2203_v58 = vpop.permute.xlu2 %224 }
 0x118   :  { %3320 = vst [vmem:[#allocation106_spill] sm:$0xff] %v2179_v60  ;;  %v2197_v60 = vmul.f32 %v2068_v18, %v419_v51  ;;  %v2230_v51 = vmul.f32 %v2068_v18, %v420_v29 }
 0x119   :  { %3321 = vst [vmem:[#allocation107_spill] sm:$0xff] %v2187_v31  ;;  %v421_v31 = vld [vmem:[#allocation2 + $0x1a] sm:$0xff] }
 0x11a   :  { %3322 = vst [vmem:[#allocation108_spill] sm:$0xff] %v2190_v61  ;;  %v2223_v61 = vmul.f32 %v1899_v52, %v2045_v62 }
 0x11b   :  { %3323 = vst [vmem:[#allocation109_spill] sm:$0xff] %v2194_v55  ;;  %v2216_v55 = vadd.f32 %v2124_v4, %v796_v19  ;;  %v798_v19 = vmul.f32 %v2041_v28, %v266_v48 }
 0x11c   :  { %3324 = vst [vmem:[#allocation110_spill] sm:$0xff] %v2197_v60  ;;  %v535_v60 = vmul.f32 %v2028_v17, %v265_v2 }
 0x11d   :  { %3325 = vst [vmem:[#allocation111_spill] sm:$0xff] %v2200_v38  ;;  %v2219_v38 = vadd.f32 %v2139_v8, %v1058_v16  ;;  %v2238_v16 = vmul.f32 %v2068_v18, %v421_v31 }
 0x11e   :  { %3326 = vst [vmem:[#allocation112_spill] sm:$0xff] %v2206_v50  ;;  %v2246_v50 = vadd.f32 %v2104_v12, %v535_v60  ;;  %v2268_v60 = vmul.f32 %v2109_v6, %v420_v29 }
 0x11f   :  { %3327 = vst [vmem:[#allocation113_spill] sm:$0xff] %v2209_v1  ;;  %v2227_v1 = vadd.f32 %v2083_v63, %v274_v25  ;;  %v1059_v25 = vmul.f32 %v2073_v15, %v265_v2 }
 0x120   :  { %3328 = vst [vmem:[#allocation114_spill] sm:$0xff] %v2212_v22  ;;  %v797_v22 = vmul.f32 %v2041_v28, %v265_v2  ;;  %v2265_v2 = vmul.f32 %v1909_v3, %v2045_v62 }
 0x121   :  { %3329 = vst [vmem:[#allocation115_spill] sm:$0xff] %v2216_v55  ;;  %v2235_v55 = vadd.f32 %v2083_v63, %v275_v20  ;;  %v1060_v20 = vmul.f32 %v2073_v15, %v266_v48  ;;  %v242_v48 = vsel %vm152_vm2, %v1572_v35, %v2047_v11  ;;  %v2299_v35 = vld [vmem:[%s3199_s1 + $0x35] ss:$0 sm:$0xff]  ;;  %v141_v11 = vpop.permute.xlu1 %140 }
 0x122   :  { %3330 = vst [vmem:[#allocation116_spill] sm:$0xff] %v2219_v38  ;;  %v2242_v38 = vmul.f32 %v1904_v33, %v2045_v62 }
 0x123   :  { %3331 = vst [vmem:[#allocation117_spill] sm:$0xff] %v2223_v61  ;;  %v2252_v61 = vmul.f32 %v2088_v13, %v421_v31 }
 0x124   :  { %3332 = vst [vmem:[#allocation118_spill] sm:$0xff] %v2230_v51  ;;  %v2249_v51 = vmul.f32 %v2088_v13, %v420_v29 }
 0x125   :  { %3333 = vst [vmem:[#allocation119_spill] sm:$0xff] %v2235_v55  ;;  %v2261_v55 = vadd.f32 %v2104_v12, %v536_v49  ;;  %v2279_v49 = vadd.f32 %v2124_v4, %v797_v22  ;;  %v2302_v22 = vadd.f32 %v2139_v8, %v1059_v25 }
 0x126   :  { %3334 = vst [vmem:[#allocation120_spill] sm:$0xff] %v2238_v16  ;;  %v2258_v16 = vld [vmem:[%s3199_s1 + $0x5] ss:$0 sm:$0xff] }
 0x127   :  { %3335 = vst [vmem:[#allocation121_spill] sm:$0xff] %v2242_v38  ;;  %v2294_v38 = vld [vmem:[%s3199_s1 + $0x25] ss:$0 sm:$0xff] }
 0x128   :  { %3336 = vst [vmem:[#allocation122_spill] sm:$0xff] %v2249_v51  ;;  %v2273_v51 = vld [vmem:[%s3199_s1 + $0x15] ss:$0 sm:$0xff] }
 0x129   :  { %3337 = vst [vmem:[#allocation123_spill] sm:$0xff] %v2252_v61  ;;  %v267_v61 = vld [vmem:[#allocation2 + $0x28] sm:$0xff] }
 0x12a   :  { %3338 = vst [vmem:[#allocation124_spill] sm:$0xff] %v2258_v16  ;;  %v276_v25 = vmul.f32 %v2008_v9, %v267_v61 }
 0x12b   :  { %3339 = vst [vmem:[#allocation125_spill] sm:$0xff] %v2261_v55  ;;  %v2282_v55 = vadd.f32 %v2124_v4, %v798_v19  ;;  %v2305_v19 = vadd.f32 %v2139_v8, %v1060_v20  ;;  %v799_v20 = vmul.f32 %v2041_v28, %v267_v61  ;;  %v2364_v28 = vmul.f32 %v2068_v18, %v422_v0 }
 0x12c   :  { %3340 = vst [vmem:[#allocation126_spill] sm:$0xff] %v2265_v2  ;;  %v2285_v2 = vmul.f32 %v2109_v6, %v421_v31 }
 0x12d   :  { %3341 = vst [vmem:[#allocation127_spill] sm:$0xff] %v2268_v60  ;;  %v2289_v60 = vmul.f32 %v1967_v27, %v2045_v62  ;;  %v2308_v62 = vmul.f32 %v2144_v59, %v420_v29  ;;  %v2324_v29 = vld [vmem:[%s3199_s1 + $0x2] ss:$0 sm:$0xff] }
 0x12e   :  { %3342 = vst [vmem:[#allocation128_spill] sm:$0xff] %v2273_v51 }
 0x12f   :  { %3343 = vst [vmem:[#allocation129_spill] sm:$0xff] %v2282_v55  ;;  %v305_v55 = vadd.f32 %v1792_v24, %v2156_v21  ;;  %v828_v21 = vadd.f32 %v1810_v47, %v2176_v32  ;;  %v537_v24 = vmul.f32 %v2028_v17, %v267_v61  ;;  %v2349_v47 = vmul.f32 %v2294_v38, %v242_v48 }
 0x130   :  { %3344 = vst [vmem:[#allocation130_spill] sm:$0xff] %v2285_v2  ;;  %v2311_v2 = vmul.f32 %v2144_v59, %v421_v31  ;;  %v2327_v31 = vmul.f32 %v2273_v51, %v242_v48  ;;  %v1090_v32 = vadd.f32 %v1823_v7, %v2184_v10  ;;  %v2368_v17 = vmul.f32 %v1904_v33, %v2051_v14 }
 0x131   :  { %3345 = vst [vmem:[#allocation131_spill] sm:$0xff] %v2289_v60  ;;  %v2316_v60 = vmul.f32 %v2258_v16, %v242_v48  ;;  %v2375_v7 = vmul.f32 %v1909_v3, %v2051_v14  ;;  %v245_v10 = vsel %vm152_vm2, %v1587_v39, %v2203_v58 }
 0x132   :  { %3346 = vst [vmem:[#allocation132_spill] sm:$0xff] %v2299_v35 }
 0x133   :  { %251 = vst [vmem:[#allocation2 + $0x91] sm:$0xff] %v242_v48 }
 0x134   :  { %3347 = vst [vmem:[#allocation133_spill] sm:$0xff] %v2302_v22  ;;  %v2361_v22 = vadd.f32 %v2083_v63, %v276_v25 }
 0x135   :  { %3348 = vst [vmem:[#allocation134_spill] sm:$0xff] %v2305_v19  ;;  %v2354_v19 = vmul.f32 %v2299_v35, %v242_v48  ;;  %v159_v48 = vsel %vm152_vm2, %v1542_v23, %v141_v11  ;;  %v2400_v11 = vmul.f32 %v1967_v27, %v2051_v14  ;;  %v2415_v14 = vmul.f32 %v2258_v16, %v245_v10 }
 0x136   :  { %3349 = vst [vmem:[#allocation135_spill] sm:$0xff] %v2308_v62  ;;  %v231_v62 = vpop.permute.xlu2 %230 }
 0x137   :  { %3350 = vst [vmem:[#allocation136_spill] sm:$0xff] %v2311_v2  ;;  %v2346_v2 = vld [vmem:[%s3199_s1 + $0x32] ss:$0 sm:$0xff]  ;;  %v248_v25 = vsel %vm152_vm2, %v1601_v46, %v231_v62  ;;  %v2403_v62 = vmul.f32 %v2144_v59, %v422_v0 }
 0x138   :  { %3351 = vst [vmem:[#allocation137_spill] sm:$0xff] %v2349_v47  ;;  %v2371_v47 = vmul.f32 %v2088_v13, %v422_v0 }
 0x139   :  { %3352 = vst [vmem:[#allocation138_spill] sm:$0xff] %v2358_v37  ;;  %v2391_v37 = vmul.f32 %v2109_v6, %v422_v0  ;;  %v2418_v0 = vmul.f32 %v2273_v51, %v245_v10 }
 0x13a   :  { %3353 = vst [vmem:[#allocation139_spill] sm:$0xff] %v2361_v22 }
 0x13b   :  { %3354 = vst [vmem:[#allocation140_spill] sm:$0xff] %v2364_v28  ;;  %v314_v28 = vld [vmem:[#allocation2 + $0x90] sm:$0xff] }
 0x13c   :  { %3355 = vst [vmem:[#allocation141_spill] sm:$0xff] %v2368_v17  ;;  %v2385_v17 = vadd.f32 %v2104_v12, %v537_v24  ;;  %v323_v39 = vmul.f32 %v2324_v29, %v314_v28  ;;  %v584_v23 = vmul.f32 %v2336_v57, %v314_v28  ;;  %v846_v58 = vmul.f32 %v2341_v40, %v314_v28 }
 0x13d   :  { %3356 = vst [vmem:[#allocation142_spill] sm:$0xff] %v2371_v47  ;;  %v2388_v47 = vadd.f32 %v2124_v4, %v799_v20  ;;  %v1108_v46 = vmul.f32 %v2346_v2, %v314_v28  ;;  %v2406_v24 = vmul.f32 %v1899_v52, %v159_v48  ;;  %v223_v28 = vpop.permute.xlu1 %222  ;;  %v2421_v52 = vmul.f32 %v2294_v38, %v245_v10 }
 0x13e   :  { %3357 = vst [vmem:[#allocation143_spill] sm:$0xff] %v2375_v7  ;;  %v1061_v7 = vmul.f32 %v2073_v15, %v267_v61  ;;  %v2409_v61 = vmul.f32 %v1904_v33, %v159_v48  ;;  %v331_v20 = vadd.f32 %v323_v39, %v305_v55  ;;  %v2434_v39 = vmul.f32 %v1967_v27, %v159_v48 }
 0x13f   :  { %3358 = vst [vmem:[#allocation144_spill] sm:$0xff] %v2385_v17  ;;  %v1116_v17 = vadd.f32 %v1108_v46, %v1090_v32  ;;  %v2428_v32 = vmul.f32 %v2299_v35, %v245_v10  ;;  %v2448_v27 = vmul.f32 %v2258_v16, %v248_v25  ;;  %v3371_v46 = vld [vmem:[#allocation137_spill] sm:$0xff] }
 0x140   :  { %3359 = vst [vmem:[#allocation145_spill] sm:$0xff] %v2388_v47  ;;  %v854_v47 = vadd.f32 %v846_v58, %v828_v21  ;;  %v2412_v22 = vadd.f32 %v2139_v8, %v1061_v7  ;;  %v357_v33 = vadd.f32 %v2077_v26, %v331_v20  ;;  %v2431_v7 = vmul.f32 %v1909_v3, %v159_v48 }
 0x141   :  { %3360 = vst [vmem:[#allocation146_spill] sm:$0xff] %v2391_v37  ;;  %v592_v37 = vadd.f32 %v584_v23, %v566_v5  ;;  %v1142_v21 = vadd.f32 %v2115_v42, %v1116_v17  ;;  %v2438_v23 = vsel %vm152_vm2, %v1555_v30, %v223_v28  ;;  %v2451_v17 = vmul.f32 %v2273_v51, %v248_v25 }
 0x142   :  { %254 = vst [vmem:[#allocation2 + $0xa9] sm:$0xff] %v245_v10  ;;  %v880_v5 = vadd.f32 %v2098_v34, %v854_v47  ;;  %v383_v26 = vadd.f32 %v1744_v36, %v357_v33  ;;  %v2454_v30 = vmul.f32 %v2294_v38, %v248_v25  ;;  %v2457_v36 = vmul.f32 %v2299_v35, %v248_v25 }
 0x143   :  { %167 = vst [vmem:[#allocation2 + $0x31] sm:$0xff] %v159_v48  ;;  %v618_v55 = vadd.f32 %v2094_v43, %v592_v37  ;;  %v1168_v43 = vadd.f32 %v1753_v45, %v1142_v21  ;;  %v569_v45 = vadd.f32 %v1882_v54, %v2246_v50  ;;  %v831_v47 = vadd.f32 %v1912_v53, %v2279_v49  ;;  %v3374_v49 = vld [vmem:[#allocation90_spill] sm:$0xff]  ;;  %v3377_v21 = vld [vmem:[#allocation133_spill] sm:$0xff] }
 0x144   :  { %3361 = vst [vmem:[#allocation147_spill] sm:$0xff] %v2400_v11  ;;  %v906_v34 = vadd.f32 %v1750_v44, %v880_v5  ;;  %v2463_v44 = vmul.f32 %v2258_v16, %v2438_v23  ;;  %v409_v10 = vadd.f32 %v2316_v60, %v383_v26  ;;  %v2484_v53 = vmul.f32 %v2294_v38, %v2438_v23  ;;  %v3378_v26 = vld [vmem:[#allocation65_spill] sm:$0xff]  ;;  %v3403_v11 = vld [vmem:[#allocation38_spill] sm:$0xff] }
 0x145   :  { %3362 = vst [vmem:[#allocation148_spill] sm:$0xff] %v2403_v62  ;;  %v644_v37 = vadd.f32 %v1747_v41, %v618_v55  ;;  %v308_v41 = vadd.f32 %v1873_v56, %v2227_v1  ;;  %v2475_v56 = vmul.f32 %v2273_v51, %v2438_v23  ;;  %v1194_v54 = vadd.f32 %v2354_v19, %v1168_v43  ;;  %v3376_v19 = vld [vmem:[#allocation93_spill] sm:$0xff] }
 0x146   :  { %3363 = vst [vmem:[#allocation149_spill] sm:$0xff] %v2409_v61  ;;  %v932_v20 = vadd.f32 %v3371_v46, %v906_v34  ;;  %v3379_v34 = vld [vmem:[#allocation100_spill] sm:$0xff]  ;;  %v2517_v46 = vld [vmem:[%s3199_s1 + $0x8] ss:$0 sm:$0xff] }
 0x147   :  { %257 = vst [vmem:[#allocation2 + $0xc1] sm:$0xff] %v248_v25  ;;  %v670_v1 = vadd.f32 %v2327_v31, %v644_v37  ;;  %v1093_v37 = vadd.f32 %v3378_v26, %v3377_v21  ;;  %v435_v43 = vadd.f32 %v3379_v34, %v409_v10  ;;  %v3383_v26 = vld [vmem:[#allocation105_spill] sm:$0xff] }
 0x148   :  { %3364 = vst [vmem:[#allocation150_spill] sm:$0xff] %v2431_v7  ;;  %v958_v10 = vadd.f32 %v3383_v26, %v932_v20  ;;  %v3396_v62 = vld [vmem:[#allocation25_spill] sm:$0xff]  ;;  %v3437_v7 = vld [vmem:[#allocation59_spill] sm:$0xff] }
 0x149   :  { %3365 = vst [vmem:[#allocation151_spill] sm:$0xff] %v2434_v39 }
 0x14a   :  { %253 = vst [vmem:[#allocation2 + $0xa1] sm:$0xff] %v2438_v23  ;;  %v268_v42 = vld [vmem:[#allocation2 + $0x30] sm:$0xff]  ;;  %v2445_v3 = vld [vmem:[#allocation2 + $0x38] sm:$0xff] }
 0x14b   :  { %3366 = vst [vmem:[#allocation152_spill] sm:$0xff] %v2445_v3  ;;  %v277_v48 = vmul.f32 %v2008_v9, %v268_v42  ;;  %v278_v25 = vmul.f32 %v2008_v9, %v2445_v3  ;;  %v423_v58 = vld [vmem:[#allocation2 + $0x2a] sm:$0xff]  ;;  %v2480_v50 = vld [vmem:[#allocation2 + $0x32] sm:$0xff]  ;;  %v538_v28 = vmul.f32 %v3374_v49, %v268_v42  ;;  %v539_v31 = vmul.f32 %v3374_v49, %v2445_v3 }
 0x14c   :  { %3367 = vst [vmem:[#allocation153_spill] sm:$0xff] %v2448_v27  ;;  %v2496_v33 = vmul.f32 %v2068_v18, %v423_v58  ;;  %v800_v55 = vmul.f32 %v3376_v19, %v268_v42  ;;  %v801_v5 = vmul.f32 %v3376_v19, %v2445_v3  ;;  %v3382_v19 = vld [vmem:[#allocation103_spill] sm:$0xff]  ;;  %v3385_v3 = vld [vmem:[#allocation108_spill] sm:$0xff]  ;;  %v2537_v20 = vmul.f32 %v2088_v13, %v423_v58 }
 0x14d   :  { %3368 = vst [vmem:[#allocation154_spill] sm:$0xff] %v2451_v17  ;;  %v2487_v60 = vadd.f32 %v2083_v63, %v277_v48  ;;  %v2490_v9 = vadd.f32 %v2083_v63, %v278_v25  ;;  %v2506_v63 = vmul.f32 %v2068_v18, %v2480_v50  ;;  %v2509_v48 = vadd.f32 %v2104_v12, %v538_v28  ;;  %v2533_v28 = vld [vmem:[%s3199_s1 + $0x28] ss:$0 sm:$0xff] }
 0x14e   :  { %3369 = vst [vmem:[#allocation155_spill] sm:$0xff] %v2454_v30  ;;  %v2512_v25 = vadd.f32 %v2104_v12, %v539_v31  ;;  %v696_v21 = vadd.f32 %v3382_v19, %v670_v1  ;;  %v2522_v34 = vadd.f32 %v2124_v4, %v801_v5  ;;  %v1062_v18 = vmul.f32 %v2073_v15, %v268_v42  ;;  %v2528_v12 = vld [vmem:[%s3199_s1 + $0x18] ss:$0 sm:$0xff]  ;;  %v3390_v30 = vld [vmem:[#allocation117_spill] sm:$0xff] }
 0x14f   :  { %3370 = vst [vmem:[#allocation156_spill] sm:$0xff] %v2457_v36  ;;  %v1220_v1 = vadd.f32 %v3385_v3, %v1194_v54  ;;  %v2541_v5 = vmul.f32 %v2088_v13, %v2480_v50  ;;  %v808_v42 = vadd.f32 %v2124_v4, %v800_v55  ;;  %v2546_v19 = vmul.f32 %v2109_v6, %v423_v58  ;;  %v2554_v3 = vld [vmem:[%s3199_s1 + $0x38] ss:$0 sm:$0xff]  ;;  %v221_v6 = vpop.permute.xlu0 %220 }
 0x150   :  { %3372 = vst [vmem:[#allocation137_spill] sm:$0xff] %v2480_v50  ;;  %v2549_v26 = vmul.f32 %v2144_v59, %v423_v58  ;;  %v1070_v55 = vadd.f32 %v2139_v8, %v1062_v18  ;;  %v3393_v8 = vld [vmem:[#allocation102_spill] sm:$0xff] }
 0x151   :  { %3373 = vst [vmem:[#allocation157_spill] sm:$0xff] %v2490_v9  ;;  %v317_v49 = vld [vmem:[#allocation2 + $0xa8] sm:$0xff]  ;;  %v3402_v9 = vld [vmem:[#allocation104_spill] sm:$0xff] }
 0x152   :  { %3375 = vst [vmem:[#allocation90_spill] sm:$0xff] %v2496_v33  ;;  %v472_v31 = vld [vmem:[#allocation2 + $0xa2] sm:$0xff]  ;;  %v326_v15 = vmul.f32 %v2324_v29, %v317_v49  ;;  %v587_v54 = vmul.f32 %v2336_v57, %v317_v49  ;;  %v849_v50 = vmul.f32 %v2341_v40, %v317_v49  ;;  %v1111_v4 = vmul.f32 %v2346_v2, %v317_v49  ;;  %v3407_v33 = vld [vmem:[#allocation54_spill] sm:$0xff] }
 0x153   :  { %3380 = vst [vmem:[#allocation93_spill] sm:$0xff] %v2506_v63  ;;  %v2558_v13 = vmul.f32 %v2517_v46, %v472_v31  ;;  %v2564_v58 = vmul.f32 %v2528_v12, %v472_v31  ;;  %v2576_v17 = vmul.f32 %v2554_v3, %v472_v31 }
 0x154   :  { %3381 = vst [vmem:[#allocation133_spill] sm:$0xff] %v2512_v25  ;;  %v334_v36 = vadd.f32 %v326_v15, %v308_v41  ;;  %v595_v59 = vadd.f32 %v587_v54, %v569_v45  ;;  %v857_v41 = vadd.f32 %v849_v50, %v831_v47  ;;  %v1119_v15 = vadd.f32 %v1111_v4, %v1093_v37  ;;  %v3394_v45 = vld [vmem:[#allocation36_spill] sm:$0xff]  ;;  %v3395_v54 = vld [vmem:[#allocation109_spill] sm:$0xff]  ;;  %v3398_v47 = vld [vmem:[#allocation126_spill] sm:$0xff] }
 0x155   :  { %3384 = vst [vmem:[#allocation65_spill] sm:$0xff] %v2522_v34  ;;  %v3391_v34 = vld [vmem:[#allocation121_spill] sm:$0xff]  ;;  %v2580_v18 = vadd.f32 %v3394_v45, %v3393_v8  ;;  %v2584_v25 = vadd.f32 %v3396_v62, %v3395_v54  ;;  %v3399_v37 = vld [vmem:[#allocation131_spill] sm:$0xff]  ;;  %v567_v8 = vadd.f32 %v3403_v11, %v3402_v9  ;;  %v3404_v45 = vld [vmem:[#allocation112_spill] sm:$0xff] }
 0x156   :  { %3386 = vst [vmem:[#allocation100_spill] sm:$0xff] %v2537_v20  ;;  %v360_v63 = vadd.f32 %v3390_v30, %v334_v36  ;;  %v621_v49 = vadd.f32 %v3391_v34, %v595_v59  ;;  %v3397_v30 = vld [vmem:[#allocation52_spill] sm:$0xff]  ;;  %v883_v50 = vadd.f32 %v3398_v47, %v857_v41  ;;  %v3400_v4 = vld [vmem:[#allocation37_spill] sm:$0xff]  ;;  %v229_v34 = vpop.permute.xlu1 %228  ;;  %v3406_v62 = vld [vmem:[#allocation39_spill] sm:$0xff] }
 0x157   :  { %3387 = vst [vmem:[#allocation103_spill] sm:$0xff] %v2541_v5  ;;  %v2567_v5 = vmul.f32 %v2533_v28, %v472_v31  ;;  %v2590_v27 = vadd.f32 %v3400_v4, %v435_v43  ;;  %v3401_v31 = vld [vmem:[#allocation53_spill] sm:$0xff]  ;;  %v722_v54 = vadd.f32 %v3406_v62, %v696_v21  ;;  %v3409_v47 = vld [vmem:[#allocation106_spill] sm:$0xff]  ;;  %v3411_v43 = vld [vmem:[#allocation115_spill] sm:$0xff] }
 0x158   :  { %3388 = vst [vmem:[#allocation105_spill] sm:$0xff] %v2546_v19  ;;  %v386_v36 = vadd.f32 %v3397_v30, %v360_v63  ;;  %v647_v59 = vadd.f32 %v3401_v31, %v621_v49  ;;  %v3405_v19 = vld [vmem:[#allocation30_spill] sm:$0xff]  ;;  %v909_v63 = vadd.f32 %v3407_v33, %v883_v50  ;;  %v3408_v30 = vld [vmem:[#allocation55_spill] sm:$0xff]  ;;  %v3412_v4 = vld [vmem:[#allocation32_spill] sm:$0xff] }
 0x159   :  { %3389 = vst [vmem:[#allocation108_spill] sm:$0xff] %v2549_v26  ;;  %v2572_v26 = vmul.f32 %v2299_v35, %v2438_v23  ;;  %v1145_v23 = vadd.f32 %v3399_v37, %v1119_v15  ;;  %v568_v20 = vadd.f32 %v3405_v19, %v3404_v45  ;;  %v3410_v15 = vld [vmem:[#allocation40_spill] sm:$0xff]  ;;  %v2606_v39 = vadd.f32 %v3412_v4, %v3411_v43  ;;  %v3413_v49 = vld [vmem:[#allocation41_spill] sm:$0xff]  ;;  %v3414_v11 = vld [vmem:[#allocation3_spill] sm:$0xff] }
 0x15a   :  { %3392 = vst [vmem:[#allocation117_spill] sm:$0xff] %v2576_v17  ;;  %v2602_v37 = vadd.f32 %v3410_v15, %v3409_v47  ;;  %v2609_v31 = vadd.f32 %v3413_v49, %v958_v10  ;;  %v243_v9 = vsel %vm152_vm2, %v3414_v11, %v221_v6  ;;  %v3415_v19 = vld [vmem:[#allocation4_spill] sm:$0xff]  ;;  %v3417_v33 = vld [vmem:[#allocation74_spill] sm:$0xff]  ;;  %v3422_v10 = vld [vmem:[#allocation43_spill] sm:$0xff] }
 0x15b   :  { %v1171_v41 = vadd.f32 %v3408_v30, %v1145_v23  ;;  %v2615_v21 = vsel %vm152_vm2, %v3415_v19, %v229_v34  ;;  %v2619_v50 = vadd.f32 %v3417_v33, %v2487_v60  ;;  %v3418_v23 = vld [vmem:[#allocation107_spill] sm:$0xff]  ;;  %v3419_v45 = vld [vmem:[#allocation42_spill] sm:$0xff]  ;;  %v3420_v30 = vld [vmem:[#allocation116_spill] sm:$0xff]  ;;  %v2630_v43 = vadd.f32 %v3422_v10, %v1220_v1  ;;  %252 = vst [vmem:[#allocation2 + $0x99] sm:$0xff] %v243_v9 }
 0x15c   :  { %3416 = vst [vmem:[#allocation121_spill] sm:$0xff] %v2615_v21  ;;  %v2623_v62 = vadd.f32 %v3419_v45, %v3418_v23  ;;  %v3421_v47 = vld [vmem:[#allocation34_spill] sm:$0xff]  ;;  %v2633_v6 = vmul.f32 %v2258_v16, %v243_v9  ;;  %v2636_v34 = vmul.f32 %v2273_v51, %v243_v9  ;;  %v2639_v60 = vmul.f32 %v2294_v38, %v243_v9  ;;  %v3423_v49 = vld [vmem:[#allocation77_spill] sm:$0xff]  ;;  %v227_v45 = vpop.permute.xlu0 %226  ;;  %v3431_v10 = vld [vmem:[#allocation56_spill] sm:$0xff] }
 0x15d   :  { %v2627_v15 = vadd.f32 %v3421_v47, %v3420_v30  ;;  %v2642_v4 = vmul.f32 %v2299_v35, %v243_v9  ;;  %256 = vst [vmem:[#allocation2 + $0xb9] sm:$0xff] %v2615_v21  ;;  %v2647_v11 = vadd.f32 %v3423_v49, %v2509_v48  ;;  %v2651_v1 = vmul.f32 %v2258_v16, %v2615_v21  ;;  %v3426_v33 = vld [vmem:[#allocation82_spill] sm:$0xff]  ;;  %v3428_v30 = vld [vmem:[#allocation85_spill] sm:$0xff]  ;;  %v3430_v48 = vld [vmem:[#allocation119_spill] sm:$0xff] }
 0x15e   :  { %v2655_v19 = vmul.f32 %v2273_v51, %v2615_v21  ;;  %v2658_v23 = vadd.f32 %v3426_v33, %v808_v42  ;;  %v2662_v9 = vmul.f32 %v2294_v38, %v2615_v21  ;;  %v2665_v47 = vadd.f32 %v3428_v30, %v1070_v55  ;;  %v3433_v35 = vld [vmem:[#allocation139_spill] sm:$0xff]  ;;  %v3439_v21 = vld [vmem:[#allocation144_spill] sm:$0xff] }
 0x15f   :  { %3424 = vst [vmem:[#allocation102_spill] sm:$0xff] %v2651_v1  ;;  %v2669_v49 = vadd.f32 %v3431_v10, %v3430_v48  ;;  %v3434_v1 = vld [vmem:[#allocation44_spill] sm:$0xff]  ;;  %v412_v33 = vadd.f32 %v2415_v14, %v386_v36  ;;  %v673_v55 = vadd.f32 %v2418_v0, %v647_v59  ;;  %v935_v30 = vadd.f32 %v2421_v52, %v909_v63  ;;  %v3442_v48 = vld [vmem:[#allocation129_spill] sm:$0xff]  ;;  %v3443_v10 = vld [vmem:[#allocation62_spill] sm:$0xff] }
 0x160   :  { %3425 = vst [vmem:[#allocation36_spill] sm:$0xff] %v2655_v19  ;;  %v2673_v17 = vadd.f32 %v3434_v1, %v3433_v35  ;;  %v3436_v19 = vld [vmem:[#allocation125_spill] sm:$0xff]  ;;  %v3446_v1 = vld [vmem:[#allocation48_spill] sm:$0xff]  ;;  %v3451_v0 = vld [vmem:[#allocation123_spill] sm:$0xff] }
 0x161   :  { %3427 = vst [vmem:[#allocation109_spill] sm:$0xff] %v2662_v9  ;;  %v2677_v42 = vadd.f32 %v3437_v7, %v3436_v19  ;;  %v3440_v9 = vld [vmem:[#allocation46_spill] sm:$0xff]  ;;  %v3445_v35 = vld [vmem:[#allocation145_spill] sm:$0xff]  ;;  %v1197_v7 = vadd.f32 %v2428_v32, %v1171_v41  ;;  %v3449_v36 = vld [vmem:[#allocation120_spill] sm:$0xff]  ;;  %v2703_v59 = vadd.f32 %v3451_v0, %v673_v55 }
 0x162   :  { %3429 = vst [vmem:[#allocation25_spill] sm:$0xff] %v2665_v47  ;;  %v2682_v61 = vadd.f32 %v3440_v9, %v3439_v21  ;;  %v3448_v19 = vld [vmem:[#allocation5_spill] sm:$0xff]  ;;  %v2700_v21 = vadd.f32 %v3449_v36, %v412_v33  ;;  %v3453_v52 = vld [vmem:[#allocation134_spill] sm:$0xff]  ;;  %v315_v32 = vld [vmem:[#allocation2 + $0x98] sm:$0xff] }
 0x163   :  { %3432 = vst [vmem:[#allocation52_spill] sm:$0xff] %v2669_v49  ;;  %v2688_v49 = vadd.f32 %v3443_v10, %v3442_v48  ;;  %v2697_v14 = vsel %vm152_vm2, %v3448_v19, %v227_v45  ;;  %v3454_v63 = vld [vmem:[#allocation66_spill] sm:$0xff]  ;;  %v2714_v41 = vld [vmem:[#allocation2 + $0xa0] sm:$0xff]  ;;  %v324_v36 = vmul.f32 %v2324_v29, %v315_v32 }
 0x164   :  { %3435 = vst [vmem:[#allocation126_spill] sm:$0xff] %v2673_v17  ;;  %v2692_v17 = vadd.f32 %v3446_v1, %v3445_v35  ;;  %v2707_v9 = vadd.f32 %v3454_v63, %v3453_v52  ;;  %v3456_v48 = vld [vmem:[#allocation50_spill] sm:$0xff]  ;;  %v3460_v55 = vld [vmem:[#allocation136_spill] sm:$0xff]  ;;  %v2726_v19 = vmul.f32 %v2258_v16, %v2697_v14  ;;  %v325_v0 = vmul.f32 %v2324_v29, %v2714_v41 }
 0x165   :  { %3438 = vst [vmem:[#allocation131_spill] sm:$0xff] %v2677_v42  ;;  %v2711_v10 = vadd.f32 %v3456_v48, %v2412_v22  ;;  %v2716_v45 = vld [vmem:[#allocation2 + $0x92] sm:$0xff]  ;;  %v2722_v1 = vadd.f32 %v3460_v55, %v1197_v7  ;;  %v2730_v22 = vmul.f32 %v2273_v51, %v2697_v14  ;;  %v2735_v52 = vld [vmem:[#allocation2 + $0x9a] sm:$0xff]  ;;  %v585_v7 = vmul.f32 %v2336_v57, %v315_v32 }
 0x166   :  { %3441 = vst [vmem:[#allocation37_spill] sm:$0xff] %v2682_v61  ;;  %v3458_v33 = vld [vmem:[#allocation130_spill] sm:$0xff]  ;;  %v480_v63 = vmul.f32 %v2517_v46, %v2735_v52  ;;  %v586_v48 = vmul.f32 %v2336_v57, %v2714_v41  ;;  %v741_v55 = vmul.f32 %v2528_v12, %v2735_v52  ;;  %v332_v51 = vadd.f32 %v324_v36, %v2580_v18 }
 0x167   :  { %3444 = vst [vmem:[#allocation53_spill] sm:$0xff] %v2688_v49  ;;  %v2719_v35 = vadd.f32 %v3458_v33, %v935_v30  ;;  %v479_v30 = vmul.f32 %v2517_v46, %v2716_v45  ;;  %v740_v33 = vmul.f32 %v2528_v12, %v2716_v45  ;;  %v333_v16 = vadd.f32 %v325_v0, %v2584_v25  ;;  %v3464_v61 = vld [vmem:[#allocation86_spill] sm:$0xff]  ;;  %v3469_v0 = vld [vmem:[#allocation12_spill] sm:$0xff] }
 0x168   :  { %3447 = vst [vmem:[#allocation104_spill] sm:$0xff] %v2692_v17  ;;  %v847_v17 = vmul.f32 %v2341_v40, %v315_v32  ;;  %v848_v49 = vmul.f32 %v2341_v40, %v2714_v41  ;;  %v358_v42 = vadd.f32 %v3464_v61, %v332_v51  ;;  %v3467_v18 = vld [vmem:[#allocation98_spill] sm:$0xff]  ;;  %v3471_v51 = vld [vmem:[#allocation13_spill] sm:$0xff] }
 0x169   :  { %3450 = vst [vmem:[#allocation38_spill] sm:$0xff] %v2700_v21  ;;  %v3466_v21 = vld [vmem:[#allocation87_spill] sm:$0xff] }
 0x16a   :  { %3452 = vst [vmem:[#allocation112_spill] sm:$0xff] %v2703_v59 }
 0x16b   :  { %3455 = vst [vmem:[#allocation30_spill] sm:$0xff] %v2707_v9  ;;  %v593_v9 = vadd.f32 %v585_v7, %v567_v8  ;;  %v3468_v8 = vld [vmem:[#allocation17_spill] sm:$0xff] }
 0x16c   :  { %3457 = vst [vmem:[#allocation39_spill] sm:$0xff] %v2711_v10  ;;  %v487_v10 = vadd.f32 %v479_v30, %v2590_v27  ;;  %v855_v27 = vadd.f32 %v847_v17, %v2602_v37  ;;  %v1002_v37 = vmul.f32 %v2533_v28, %v2716_v45 }
 0x16d   :  { %255 = vst [vmem:[#allocation2 + $0xb1] sm:$0xff] %v2697_v14  ;;  %v619_v47 = vadd.f32 %v3466_v21, %v593_v9  ;;  %v3473_v21 = vld [vmem:[#allocation99_spill] sm:$0xff] }
 0x16e   :  { %3459 = vst [vmem:[#allocation54_spill] sm:$0xff] %v2719_v35  ;;  %v495_v59 = vmax.f32 %v487_v10, 0.0  ;;  %v3472_v10 = vld [vmem:[#allocation88_spill] sm:$0xff] }
 0x16f   :  { %3461 = vst [vmem:[#allocation55_spill] sm:$0xff] %v2722_v1  ;;  %v3465_v1 = vld [vmem:[#allocation97_spill] sm:$0xff] }
 0x170   :  { %3462 = vst [vmem:[#allocation106_spill] sm:$0xff] %v2726_v19  ;;  %v748_v19 = vadd.f32 %v740_v33, %v722_v54  ;;  %v359_v35 = vadd.f32 %v3465_v1, %v333_v16  ;;  %v384_v54 = vadd.f32 %v3468_v8, %v358_v42  ;;  %v503_v7 = vmul.f32 2.0, %v495_v59 }
 0x171   :  { %3463 = vst [vmem:[#allocation40_spill] sm:$0xff] %v2730_v22  ;;  %v594_v22 = vadd.f32 %v586_v48, %v568_v20  ;;  %v856_v20 = vadd.f32 %v848_v49, %v2606_v39  ;;  %v3470_v48 = vld [vmem:[#allocation21_spill] sm:$0xff]  ;;  %v881_v1 = vadd.f32 %v3472_v10, %v855_v27  ;;  %v3474_v49 = vld [vmem:[#allocation22_spill] sm:$0xff]  ;;  %v1010_v27 = vadd.f32 %v1002_v37, %v2609_v31  ;;  %v3483_v10 = vld [vmem:[#allocation60_spill] sm:$0xff] }
 0x172   :  { %v756_v25 = vmax.f32 %v748_v19, 0.0  ;;  %v385_v30 = vadd.f32 %v3469_v0, %v359_v35  ;;  %v645_v33 = vadd.f32 %v3470_v48, %v619_v47  ;;  %v410_v19 = vadd.f32 %v2633_v6, %v384_v54  ;;  %511 = vst [vmem:[%s3200_s2] sm:$0xff] %v503_v7  ;;  %v3475_v6 = vld [vmem:[#allocation14_spill] sm:$0xff]  ;;  %v3481_v48 = vld [vmem:[#allocation57_spill] sm:$0xff]  ;;  %v3485_v31 = vld [vmem:[#allocation127_spill] sm:$0xff] }
 0x173   :  { %v620_v36 = vadd.f32 %v3467_v18, %v594_v22  ;;  %v882_v9 = vadd.f32 %v3473_v21, %v856_v20  ;;  %v907_v42 = vadd.f32 %v3474_v49, %v881_v1  ;;  %v3476_v35 = vld [vmem:[#allocation110_spill] sm:$0xff]  ;;  %v1109_v0 = vmul.f32 %v2346_v2, %v315_v32  ;;  %v3484_v21 = vld [vmem:[#allocation113_spill] sm:$0xff] }
 0x174   :  { %v764_v16 = vmul.f32 2.0, %v756_v25  ;;  %v411_v17 = vadd.f32 %v2463_v44, %v385_v30  ;;  %v671_v39 = vadd.f32 %v2636_v34, %v645_v33  ;;  %v1003_v44 = vmul.f32 %v2533_v28, %v2735_v52  ;;  %v3477_v18 = vld [vmem:[#allocation118_spill] sm:$0xff]  ;;  %v3480_v30 = vld [vmem:[#allocation29_spill] sm:$0xff] }
 0x175   :  { %v646_v61 = vadd.f32 %v3471_v51, %v620_v36  ;;  %v908_v59 = vadd.f32 %v3475_v6, %v882_v9  ;;  %v436_v22 = vadd.f32 %v3476_v35, %v410_v19  ;;  %v3478_v36 = vld [vmem:[#allocation111_spill] sm:$0xff]  ;;  %v933_v8 = vadd.f32 %v2639_v60, %v907_v42 }
 0x176   :  { %1319 = vst [vmem:[%s3200_s2 + $0x40] sm:$0xff] %v764_v16  ;;  %v437_v34 = vadd.f32 %v3477_v18, %v411_v17  ;;  %v697_v25 = vadd.f32 %v3478_v36, %v671_v39  ;;  %v3482_v51 = vld [vmem:[#allocation31_spill] sm:$0xff]  ;;  %v1018_v16 = vmax.f32 %v1010_v27, 0.0  ;;  %v1110_v60 = vmul.f32 %v2346_v2, %v2714_v41  ;;  %v320_v36 = vld [vmem:[#allocation2 + $0xc0] sm:$0xff] }
 0x177   :  { %v672_v47 = vadd.f32 %v2475_v56, %v646_v61  ;;  %v3479_v56 = vld [vmem:[#allocation122_spill] sm:$0xff]  ;;  %v934_v54 = vadd.f32 %v2484_v53, %v908_v59  ;;  %v462_v7 = vadd.f32 %v3480_v30, %v436_v22  ;;  %v959_v9 = vadd.f32 %v3484_v21, %v933_v8  ;;  %v3487_v42 = vld [vmem:[#allocation63_spill] sm:$0xff] }
 0x178   :  { %v463_v33 = vadd.f32 %v3481_v48, %v437_v34  ;;  %v723_v61 = vadd.f32 %v3482_v51, %v697_v25  ;;  %v1026_v39 = vmul.f32 2.0, %v1018_v16  ;;  %v1117_v59 = vadd.f32 %v1109_v0, %v2623_v62  ;;  %v3489_v62 = vld [vmem:[#allocation101_spill] sm:$0xff]  ;;  %v3490_v30 = vld [vmem:[#allocation23_spill] sm:$0xff] }
 0x179   :  { %v698_v20 = vadd.f32 %v3479_v56, %v672_v47  ;;  %v960_v19 = vadd.f32 %v3485_v31, %v934_v54  ;;  %v488_v17 = vadd.f32 %v480_v63, %v462_v7  ;;  %v3486_v47 = vld [vmem:[#allocation33_spill] sm:$0xff]  ;;  %v1118_v41 = vadd.f32 %v1110_v60, %v2627_v15  ;;  %v3491_v15 = vld [vmem:[#allocation15_spill] sm:$0xff] }
 0x17a   :  { %v489_v53 = vadd.f32 %v2558_v13, %v463_v33  ;;  %v749_v32 = vadd.f32 %v741_v55, %v723_v61  ;;  %v985_v49 = vadd.f32 %v3486_v47, %v959_v9  ;;  %1337 = vst [vmem:[%s3200_s2 + $0x80] sm:$0xff] %v1026_v39  ;;  %v329_v48 = vmul.f32 %v2324_v29, %v320_v36  ;;  %v2818_v33 = vld [vmem:[#allocation2 + $0xba] sm:$0xff] }
 0x17b   :  { %v724_v1 = vadd.f32 %v3483_v10, %v698_v20  ;;  %v986_v6 = vadd.f32 %v3487_v42, %v960_v19  ;;  %v496_v35 = vmax.f32 %v488_v17, 0.0  ;;  %v1144_v20 = vadd.f32 %v3489_v62, %v1118_v41  ;;  %v3494_v39 = vld [vmem:[#allocation35_spill] sm:$0xff]  ;;  %v3502_v62 = vld [vmem:[#allocation117_spill] sm:$0xff] }
 0x17c   :  { %v497_v22 = vmax.f32 %v489_v53, 0.0  ;;  %v757_v18 = vmax.f32 %v749_v32, 0.0  ;;  %v1011_v63 = vadd.f32 %v1003_v44, %v985_v49  ;;  %v2822_v51 = vmul.f32 %v2294_v38, %v2697_v14 }
 0x17d   :  { %v750_v37 = vadd.f32 %v2564_v58, %v724_v1  ;;  %v1012_v55 = vadd.f32 %v2567_v5, %v986_v6  ;;  %v3488_v58 = vld [vmem:[#allocation91_spill] sm:$0xff]  ;;  %v504_v25 = vmul.f32 2.0, %v496_v35  ;;  %v1170_v44 = vadd.f32 %v3491_v15, %v1144_v20  ;;  %v3506_v15 = vld [vmem:[#allocation54_spill] sm:$0xff] }
 0x17e   :  { %v1143_v34 = vadd.f32 %v3488_v58, %v1117_v59  ;;  %v505_v27 = vmul.f32 2.0, %v497_v22  ;;  %v765_v56 = vmul.f32 2.0, %v757_v18  ;;  %v1019_v54 = vmax.f32 %v1011_v63, 0.0  ;;  %v3495_v6 = vld [vmem:[#allocation67_spill] sm:$0xff] }
 0x17f   :  { %v758_v13 = vmax.f32 %v750_v37, 0.0  ;;  %v1020_v0 = vmax.f32 %v1012_v55, 0.0  ;;  %512 = vst [vmem:[%s3200_s2 + $0x8] sm:$0xff] %v504_v25  ;;  %v1264_v5 = vmul.f32 %v2554_v3, %v2716_v45  ;;  %v1265_v1 = vmul.f32 %v2554_v3, %v2735_v52  ;;  %v3499_v55 = vld [vmem:[#allocation25_spill] sm:$0xff] }
 0x180   :  { %v1169_v7 = vadd.f32 %v3490_v30, %v1143_v34  ;;  %513 = vst [vmem:[%s3200_s2 + $0x10] sm:$0xff] %v505_v27  ;;  %v1027_v61 = vmul.f32 2.0, %v1019_v54  ;;  %v1196_v45 = vadd.f32 %v2572_v26, %v1170_v44  ;;  %v337_v9 = vadd.f32 %v329_v48, %v2619_v50  ;;  %v3493_v50 = vld [vmem:[#allocation135_spill] sm:$0xff]  ;;  %v3501_v34 = vld [vmem:[#allocation58_spill] sm:$0xff]  ;;  %v3505_v30 = vld [vmem:[#allocation61_spill] sm:$0xff] }
 0x181   :  { %v766_v8 = vmul.f32 2.0, %v758_v13  ;;  %v1028_v16 = vmul.f32 2.0, %v1020_v0  ;;  %1320 = vst [vmem:[%s3200_s2 + $0x48] sm:$0xff] %v765_v56  ;;  %v1272_v21 = vadd.f32 %v1264_v5, %v2630_v43  ;;  %v590_v31 = vmul.f32 %v2336_v57, %v320_v36  ;;  %v3498_v13 = vld [vmem:[#allocation150_spill] sm:$0xff]  ;;  %v2877_v56 = vld [vmem:[#allocation2 + $0xb8] sm:$0xff]  ;;  %v3504_v0 = vld [vmem:[#allocation112_spill] sm:$0xff] }
 0x182   :  { %v1195_v10 = vadd.f32 %v2642_v4, %v1169_v7  ;;  %v3492_v4 = vld [vmem:[#allocation114_spill] sm:$0xff]  ;;  %v2843_v52 = vmul.f32 %v2517_v46, %v2818_v33  ;;  %v2847_v60 = vmul.f32 %v2528_v12, %v2818_v33  ;;  %v852_v26 = vmul.f32 %v2341_v40, %v320_v36  ;;  %1338 = vst [vmem:[%s3200_s2 + $0x88] sm:$0xff] %v1027_v61  ;;  %v3507_v44 = vld [vmem:[#allocation64_spill] sm:$0xff] }
 0x183   :  { %1321 = vst [vmem:[%s3200_s2 + $0x50] sm:$0xff] %v766_v8  ;;  %v1222_v43 = vadd.f32 %v3493_v50, %v1196_v45  ;;  %v1280_v17 = vmax.f32 %v1272_v21, 0.0  ;;  %v363_v53 = vadd.f32 %v2406_v24, %v337_v9  ;;  %v598_v32 = vadd.f32 %v590_v31, %v2647_v11  ;;  %v3496_v24 = vld [vmem:[#allocation10_spill] sm:$0xff]  ;;  %v3497_v11 = vld [vmem:[#allocation149_spill] sm:$0xff]  ;;  %v3503_v8 = vld [vmem:[#allocation11_spill] sm:$0xff] }
 0x184   :  { %v1221_v19 = vadd.f32 %v3492_v4, %v1195_v10  ;;  %1339 = vst [vmem:[%s3200_s2 + $0x90] sm:$0xff] %v1028_v16  ;;  %v860_v47 = vadd.f32 %v852_v26, %v2658_v23  ;;  %v2863_v49 = vmul.f32 %v2533_v28, %v2818_v33  ;;  %v1114_v42 = vmul.f32 %v2346_v2, %v320_v36  ;;  %v3500_v23 = vld [vmem:[#allocation38_spill] sm:$0xff]  ;;  %v3508_v16 = vld [vmem:[#allocation69_spill] sm:$0xff]  ;;  %v3510_v21 = vld [vmem:[#allocation55_spill] sm:$0xff] }
 0x185   :  { %v1248_v59 = vadd.f32 %v3495_v6, %v1222_v43  ;;  %v1288_v35 = vmul.f32 2.0, %v1280_v17  ;;  %v2868_v22 = vadd.f32 %v3496_v24, %v363_v53  ;;  %v624_v18 = vadd.f32 %v3497_v11, %v598_v32  ;;  %v2875_v27 = vld [vmem:[#allocation2 + $0xb0] sm:$0xff]  ;;  %v3511_v9 = vld [vmem:[#allocation68_spill] sm:$0xff]  ;;  %v3515_v11 = vld [vmem:[#allocation131_spill] sm:$0xff] }
 0x186   :  { %v1247_v37 = vadd.f32 %v3494_v39, %v1221_v19  ;;  %v886_v63 = vadd.f32 %v3498_v13, %v860_v47  ;;  %v1122_v58 = vadd.f32 %v1114_v42, %v3499_v55  ;;  %v464_v25 = vadd.f32 %v3501_v34, %v3500_v23  ;;  %v2879_v36 = vld [vmem:[#allocation2 + $0xaa] sm:$0xff]  ;;  %v2892_v48 = vld [vmem:[#allocation2 + $0xb2] sm:$0xff]  ;;  %v3513_v47 = vld [vmem:[#allocation52_spill] sm:$0xff] }
 0x187   :  { %v1274_v20 = vadd.f32 %v3502_v62, %v1248_v59  ;;  %1355 = vst [vmem:[%s3200_s2 + $0xc0] sm:$0xff] %v1288_v35  ;;  %v2886_v54 = vadd.f32 %v3503_v8, %v624_v18  ;;  %v725_v7 = vadd.f32 %v3505_v30, %v3504_v0  ;;  %v987_v5 = vadd.f32 %v3507_v44, %v3506_v15  ;;  %v3512_v17 = vld [vmem:[#allocation70_spill] sm:$0xff]  ;;  %v3518_v62 = vld [vmem:[#allocation37_spill] sm:$0xff]  ;;  %v3520_v44 = vld [vmem:[#allocation24_spill] sm:$0xff] }
 0x188   :  { %v1273_v41 = vadd.f32 %v1265_v1, %v1247_v37  ;;  %v2895_v10 = vadd.f32 %v3508_v16, %v886_v63  ;;  %v3509_v1 = vld [vmem:[#allocation151_spill] sm:$0xff]  ;;  %v2900_v31 = vadd.f32 %v3511_v9, %v3510_v21  ;;  %v327_v19 = vmul.f32 %v2324_v29, %v2875_v27  ;;  %v3514_v6 = vld [vmem:[#allocation126_spill] sm:$0xff]  ;;  %v3516_v63 = vld [vmem:[#allocation92_spill] sm:$0xff] }
 0x189   :  { %v1148_v45 = vadd.f32 %v3509_v1, %v1122_v58  ;;  %v1282_v4 = vmax.f32 %v1274_v20, 0.0  ;;  %v328_v26 = vmul.f32 %v2324_v29, %v2877_v56  ;;  %v482_v50 = vmul.f32 %v2517_v46, %v2879_v36  ;;  %v3517_v58 = vld [vmem:[#allocation138_spill] sm:$0xff]  ;;  %v3521_v16 = vld [vmem:[#allocation16_spill] sm:$0xff]  ;;  %v3522_v21 = vld [vmem:[#allocation53_spill] sm:$0xff] }
 0x18a   :  { %v1281_v61 = vmax.f32 %v1273_v41, 0.0  ;;  %v483_v32 = vmul.f32 %v2517_v46, %v2892_v48  ;;  %v588_v39 = vmul.f32 %v2336_v57, %v2875_v27  ;;  %v335_v42 = vadd.f32 %v327_v19, %v3513_v47  ;;  %v3519_v8 = vld [vmem:[#allocation94_spill] sm:$0xff] }
 0x18b   :  { %v2909_v53 = vadd.f32 %v3512_v17, %v1148_v45  ;;  %v1290_v37 = vmul.f32 2.0, %v1282_v4  ;;  %v336_v59 = vadd.f32 %v328_v26, %v3514_v6  ;;  %v490_v35 = vadd.f32 %v482_v50, %v464_v25  ;;  %v3523_v4 = vld [vmem:[#allocation141_spill] sm:$0xff]  ;;  %v3524_v26 = vld [vmem:[#allocation26_spill] sm:$0xff]  ;;  %v3525_v17 = vld [vmem:[#allocation104_spill] sm:$0xff] }
 0x18c   :  { %v1289_v43 = vmul.f32 2.0, %v1281_v61  ;;  %v589_v24 = vmul.f32 %v2336_v57, %v2877_v56  ;;  %v596_v18 = vadd.f32 %v588_v39, %v3515_v11  ;;  %v743_v41 = vmul.f32 %v2528_v12, %v2879_v36  ;;  %v3528_v6 = vld [vmem:[#allocation95_spill] sm:$0xff] }
 0x18d   :  { %v744_v13 = vmul.f32 %v2528_v12, %v2892_v48  ;;  %1357 = vst [vmem:[%s3200_s2 + $0xd0] sm:$0xff] %v1290_v37  ;;  %v361_v55 = vadd.f32 %v3516_v63, %v335_v42  ;;  %v362_v23 = vadd.f32 %v3517_v58, %v336_v59  ;;  %v498_v34 = vmax.f32 %v490_v35, 0.0  ;;  %v3526_v37 = vld [vmem:[#allocation106_spill] sm:$0xff] }
 0x18e   :  { %1356 = vst [vmem:[%s3200_s2 + $0xc8] sm:$0xff] %v1289_v43  ;;  %v850_v25 = vmul.f32 %v2341_v40, %v2875_v27  ;;  %v597_v20 = vadd.f32 %v589_v24, %v3518_v62  ;;  %v622_v0 = vadd.f32 %v3519_v8, %v596_v18  ;;  %v751_v30 = vadd.f32 %v743_v41, %v725_v7  ;;  %v3527_v7 = vld [vmem:[#allocation102_spill] sm:$0xff]  ;;  %v3530_v18 = vld [vmem:[#allocation40_spill] sm:$0xff] }
 0x18f   :  { %v851_v15 = vmul.f32 %v2341_v40, %v2877_v56  ;;  %v387_v61 = vadd.f32 %v3520_v44, %v361_v55  ;;  %v388_v1 = vadd.f32 %v3521_v16, %v362_v23  ;;  %v506_v45 = vmul.f32 2.0, %v498_v34  ;;  %v3529_v24 = vld [vmem:[#allocation18_spill] sm:$0xff]  ;;  %v3531_v55 = vld [vmem:[#allocation143_spill] sm:$0xff]  ;;  %v3532_v23 = vld [vmem:[#allocation140_spill] sm:$0xff] }
 0x190   :  { %v858_v9 = vadd.f32 %v850_v25, %v3522_v21  ;;  %v623_v19 = vadd.f32 %v3523_v4, %v597_v20  ;;  %v648_v50 = vadd.f32 %v3524_v26, %v622_v0  ;;  %v759_v43 = vmax.f32 %v751_v30, 0.0  ;;  %v3533_v25 = vld [vmem:[#allocation90_spill] sm:$0xff]  ;;  %v3534_v20 = vld [vmem:[#allocation27_spill] sm:$0xff]  ;;  %v3535_v30 = vld [vmem:[#allocation36_spill] sm:$0xff] }
 0x191   :  { %v859_v39 = vadd.f32 %v851_v15, %v3525_v17  ;;  %v413_v47 = vadd.f32 %v3526_v37, %v387_v61  ;;  %v414_v42 = vadd.f32 %v3527_v7, %v388_v1  ;;  %514 = vst [vmem:[%s3200_s2 + $0x18] sm:$0xff] %v506_v45  ;;  %v1005_v35 = vmul.f32 %v2533_v28, %v2879_v36  ;;  %v3536_v44 = vld [vmem:[#allocation142_spill] sm:$0xff]  ;;  %v3537_v16 = vld [vmem:[#allocation19_spill] sm:$0xff]  ;;  %v3538_v21 = vld [vmem:[#allocation45_spill] sm:$0xff] }
 0x192   :  { %v884_v59 = vadd.f32 %v3528_v6, %v858_v9  ;;  %v649_v11 = vadd.f32 %v3529_v24, %v623_v19  ;;  %v674_v41 = vadd.f32 %v3530_v18, %v648_v50  ;;  %v767_v63 = vmul.f32 2.0, %v759_v43  ;;  %v3539_v4 = vld [vmem:[#allocation76_spill] sm:$0xff] }
 0x193   :  { %v885_v58 = vadd.f32 %v3531_v55, %v859_v39  ;;  %v439_v34 = vadd.f32 %v3532_v23, %v413_v47  ;;  %v440_v62 = vadd.f32 %v3533_v25, %v414_v42  ;;  %v1006_v0 = vmul.f32 %v2533_v28, %v2892_v48  ;;  %v3540_v43 = vld [vmem:[#allocation100_spill] sm:$0xff]  ;;  %v3541_v39 = vld [vmem:[#allocation47_spill] sm:$0xff]  ;;  %v3542_v47 = vld [vmem:[#allocation109_spill] sm:$0xff] }
 0x194   :  { %v910_v8 = vadd.f32 %v3534_v20, %v884_v59  ;;  %v675_v15 = vadd.f32 %v3535_v30, %v649_v11  ;;  %v700_v61 = vadd.f32 %v3536_v44, %v674_v41  ;;  %1322 = vst [vmem:[%s3200_s2 + $0x58] sm:$0xff] %v767_v63  ;;  %v1013_v45 = vadd.f32 %v1005_v35, %v987_v5  ;;  %v3543_v5 = vld [vmem:[#allocation146_spill] sm:$0xff]  ;;  %v3544_v11 = vld [vmem:[#allocation80_spill] sm:$0xff]  ;;  %v3545_v41 = vld [vmem:[#allocation105_spill] sm:$0xff] }
 0x195   :  { %v911_v1 = vadd.f32 %v3537_v16, %v885_v58  ;;  %v465_v9 = vadd.f32 %v3538_v21, %v439_v34  ;;  %v466_v19 = vadd.f32 %v3539_v4, %v440_v62  ;;  %v1112_v50 = vmul.f32 %v2346_v2, %v2875_v27  ;;  %v3546_v23 = vld [vmem:[#allocation49_spill] sm:$0xff]  ;;  %v3547_v25 = vld [vmem:[#allocation30_spill] sm:$0xff]  ;;  %v3548_v20 = vld [vmem:[#allocation84_spill] sm:$0xff] }
 0x196   :  { %v936_v26 = vadd.f32 %v2822_v51, %v910_v8  ;;  %v701_v17 = vadd.f32 %v3540_v43, %v675_v15  ;;  %v726_v37 = vadd.f32 %v3541_v39, %v700_v61  ;;  %v1021_v42 = vmax.f32 %v1013_v45, 0.0  ;;  %v3550_v61 = vld [vmem:[#allocation96_spill] sm:$0xff] }
 0x197   :  { %v937_v7 = vadd.f32 %v3542_v47, %v911_v1  ;;  %v491_v6 = vadd.f32 %v483_v32, %v465_v9  ;;  %v492_v59 = vadd.f32 %v2843_v52, %v466_v19  ;;  %v1113_v24 = vmul.f32 %v2346_v2, %v2877_v56  ;;  %v3549_v56 = vld [vmem:[#allocation39_spill] sm:$0xff]  ;;  %v3552_v19 = vld [vmem:[#allocation28_spill] sm:$0xff] }
 0x198   :  { %v962_v35 = vadd.f32 %v3543_v5, %v936_v26  ;;  %v727_v51 = vadd.f32 %v3544_v11, %v701_v17  ;;  %v752_v18 = vadd.f32 %v744_v13, %v726_v37  ;;  %v1029_v63 = vmul.f32 2.0, %v1021_v42  ;;  %v3551_v9 = vld [vmem:[#allocation147_spill] sm:$0xff]  ;;  %v3554_v17 = vld [vmem:[#allocation121_spill] sm:$0xff]  ;;  %v3555_v47 = vld [vmem:[#allocation20_spill] sm:$0xff] }
 0x199   :  { %v963_v27 = vadd.f32 %v3545_v41, %v937_v7  ;;  %v499_v55 = vmax.f32 %v491_v6, 0.0  ;;  %v500_v58 = vmax.f32 %v492_v59, 0.0  ;;  %v1120_v62 = vadd.f32 %v1112_v50, %v3547_v25  ;;  %v3553_v50 = vld [vmem:[#allocation132_spill] sm:$0xff]  ;;  %v3557_v59 = vld [vmem:[#allocation75_spill] sm:$0xff]  ;;  %v3558_v11 = vld [vmem:[#allocation153_spill] sm:$0xff] }
 0x19a   :  { %v988_v34 = vadd.f32 %v3546_v23, %v962_v35  ;;  %v753_v32 = vadd.f32 %v2847_v60, %v727_v51  ;;  %v760_v52 = vmax.f32 %v752_v18, 0.0  ;;  %1340 = vst [vmem:[%s3200_s2 + $0x98] sm:$0xff] %v1029_v63  ;;  %v1121_v13 = vadd.f32 %v1113_v24, %v3549_v56  ;;  %v3559_v18 = vld [vmem:[#allocation133_spill] sm:$0xff]  ;;  %v3560_v41 = vld [vmem:[#allocation79_spill] sm:$0xff] }
 0x19b   :  { %v989_v8 = vadd.f32 %v3548_v20, %v963_v27  ;;  %v507_v30 = vmul.f32 2.0, %v499_v55  ;;  %v508_v15 = vmul.f32 2.0, %v500_v58  ;;  %v1146_v16 = vadd.f32 %v3550_v61, %v1120_v62  ;;  %v3562_v58 = vld [vmem:[#allocation154_spill] sm:$0xff]  ;;  %v3564_v25 = vld [vmem:[#allocation83_spill] sm:$0xff] }
 0x19c   :  { %v1014_v44 = vadd.f32 %v1006_v0, %v988_v34  ;;  %v761_v1 = vmax.f32 %v753_v32, 0.0  ;;  %v768_v45 = vmul.f32 2.0, %v760_v52  ;;  %v1147_v60 = vadd.f32 %v3551_v9, %v1121_v13  ;;  %v3563_v34 = vld [vmem:[#allocation65_spill] sm:$0xff]  ;;  %v233_v32 = vpop.permute.xlu0 %232  ;;  %v3567_v13 = vld [vmem:[#allocation155_spill] sm:$0xff] }
 0x19d   :  { %v1015_v21 = vadd.f32 %v2863_v49, %v989_v8  ;;  %515 = vst [vmem:[%s3200_s2 + $0x20] sm:$0xff] %v507_v30  ;;  %v1172_v26 = vadd.f32 %v3552_v19, %v1146_v16  ;;  %v1190_v43 = vmul.f32 %v3553_v50, %v2697_v14  ;;  %v1267_v0 = vmul.f32 %v2554_v3, %v2879_v36  ;;  %v3556_v36 = vld [vmem:[#allocation157_spill] sm:$0xff]  ;;  %v3569_v61 = vld [vmem:[#allocation103_spill] sm:$0xff]  ;;  %v3573_v19 = vld [vmem:[#allocation6_spill] sm:$0xff] }
 0x19e   :  { %v1022_v4 = vmax.f32 %v1014_v44, 0.0  ;;  %v1191_v39 = vmul.f32 %v3553_v50, %v3554_v17  ;;  %516 = vst [vmem:[%s3200_s2 + $0x28] sm:$0xff] %v508_v15  ;;  %v769_v49 = vmul.f32 2.0, %v761_v1  ;;  %v1173_v7 = vadd.f32 %v3555_v47, %v1147_v60  ;;  %v3566_v8 = vld [vmem:[#allocation93_spill] sm:$0xff]  ;;  %v3570_v1 = vld [vmem:[#allocation156_spill] sm:$0xff] }
 0x19f   :  { %v1023_v37 = vmax.f32 %v1015_v21, 0.0  ;;  %1323 = vst [vmem:[%s3200_s2 + $0x60] sm:$0xff] %v768_v45  ;;  %v1198_v14 = vadd.f32 %v1190_v43, %v1172_v26  ;;  %v1275_v6 = vadd.f32 %v1267_v0, %v2900_v31  ;;  %v3011_v5 = vadd.f32 %v3557_v59, %v3556_v36  ;;  %v3561_v31 = vld [vmem:[#allocation148_spill] sm:$0xff]  ;;  %v3571_v9 = vld [vmem:[#allocation89_spill] sm:$0xff] }
 0x1a0   :  { %v1030_v42 = vmul.f32 2.0, %v1022_v4  ;;  %1324 = vst [vmem:[%s3200_s2 + $0x68] sm:$0xff] %v769_v49  ;;  %v1199_v24 = vadd.f32 %v1191_v39, %v1173_v7  ;;  %v415_v51 = vadd.f32 %v3558_v11, %v2868_v22  ;;  %v3020_v27 = vadd.f32 %v3560_v41, %v3559_v18  ;;  %v3565_v22 = vld [vmem:[#allocation108_spill] sm:$0xff]  ;;  %v3572_v4 = vld [vmem:[#allocation78_spill] sm:$0xff]  ;;  %v3576_v49 = vld [vmem:[#allocation137_spill] sm:$0xff] }
 0x1a1   :  { %v1031_v35 = vmul.f32 2.0, %v1023_v37  ;;  %v1224_v63 = vadd.f32 %v3561_v31, %v1198_v14  ;;  %v1283_v55 = vmax.f32 %v1275_v6, 0.0  ;;  %v676_v23 = vadd.f32 %v3562_v58, %v2886_v54  ;;  %v3568_v54 = vld [vmem:[#allocation51_spill] sm:$0xff]  ;;  %v3574_v50 = vld [vmem:[#allocation152_spill] sm:$0xff] }
 0x1a2   :  { %1341 = vst [vmem:[%s3200_s2 + $0xa0] sm:$0xff] %v1030_v42  ;;  %v3030_v62 = vadd.f32 %v3564_v25, %v3563_v34  ;;  %v1225_v52 = vadd.f32 %v3565_v22, %v1199_v24  ;;  %v1268_v20 = vmul.f32 %v2554_v3, %v2892_v48  ;;  %v441_v56 = vadd.f32 %v3566_v8, %v415_v51  ;;  %v3065_v39 = vld [vmem:[%s3199_s1 + $0x26] ss:$0 sm:$0xff]  ;;  %v1409_v14 = vld [vmem:[%s3199_s1 + $0x39] ss:$0 sm:$0xff]  ;;  %v1413_v31 = vld [vmem:[#allocation2 + $0x7a] sm:$0xff] }
 0x1a3   :  { %1342 = vst [vmem:[%s3200_s2 + $0xa8] sm:$0xff] %v1031_v35  ;;  %v938_v30 = vadd.f32 %v3567_v13, %v2895_v10  ;;  %v1250_v15 = vadd.f32 %v3568_v54, %v1224_v63  ;;  %v1291_v44 = vmul.f32 2.0, %v1283_v55  ;;  %v702_v16 = vadd.f32 %v3569_v61, %v676_v23  ;;  %v1407_v10 = vld [vmem:[%s3199_s1 + $0x30] ss:$0 sm:$0xff]  ;;  %v3069_v42 = vld [vmem:[#allocation2 + $0x82] sm:$0xff]  ;;  %v3074_v35 = vld [vmem:[#allocation2 + $0x3a] sm:$0xff] }
 0x1a4   :  { %v1200_v45 = vadd.f32 %v3570_v1, %v2909_v53  ;;  %v1269_v21 = vmul.f32 %v2554_v3, %v2818_v33  ;;  %v1251_v60 = vadd.f32 %v3571_v9, %v1225_v52  ;;  %v467_v48 = vadd.f32 %v3572_v4, %v441_v56  ;;  %v3575_v33 = vld [vmem:[#allocation81_spill] sm:$0xff]  ;;  %v1411_v51 = vld [vmem:[%s3199_s1 + $0x34] ss:$0 sm:$0xff]  ;;  %v3084_v41 = vld [vmem:[%s3199_s1 + $0x27] ss:$0 sm:$0xff] }
 0x1a5   :  { %v3051_v26 = vsel %vm152_vm2, %v3573_v19, %v233_v32  ;;  %v1063_v43 = vmul.f32 %v1407_v10, %v3574_v50  ;;  %v1276_v0 = vadd.f32 %v1268_v20, %v1250_v15  ;;  %1358 = vst [vmem:[%s3200_s2 + $0xd8] sm:$0xff] %v1291_v44  ;;  %v728_v53 = vadd.f32 %v3575_v33, %v702_v16  ;;  %v1410_v11 = vld [vmem:[#allocation2 + $0x81] sm:$0xff]  ;;  %v1414_v55 = vld [vmem:[%s3199_s1 + $0x31] ss:$0 sm:$0xff]  ;;  %v3093_v34 = vld [vmem:[%s3199_s1 + $0x36] ss:$0 sm:$0xff] }
 0x1a6   :  { %v1277_v17 = vadd.f32 %v1269_v21, %v1251_v60  ;;  %258 = vst [vmem:[#allocation2 + $0xc9] sm:$0xff] %v3051_v26  ;;  %v956_v37 = vmul.f32 %v3065_v39, %v3576_v49  ;;  %v3079_v18 = vmul.f32 %v1411_v51, %v1410_v11  ;;  %v982_v63 = vmul.f32 %v1413_v31, %v3084_v41  ;;  %v1415_v58 = vld [vmem:[#allocation2 + $0x80] sm:$0xff]  ;;  %v1418_v52 = vld [vmem:[%s3199_s1 + $0x17] ss:$0 sm:$0xff] }
 0x1a7   :  { %v1284_v47 = vmax.f32 %v1276_v0, 0.0  ;;  %v1071_v6 = vadd.f32 %v1409_v14, %v1063_v43  ;;  %v1089_v23 = vmul.f32 %v1415_v58, %v1414_v55  ;;  %v1218_v25 = vmul.f32 %v3093_v34, %v3576_v49  ;;  %v1417_v32 = vld [vmem:[%s3199_s1 + $0x7] ss:$0 sm:$0xff]  ;;  %v3115_v8 = vld [vmem:[%s3199_s1 + $0x37] ss:$0 sm:$0xff]  ;;  %v1420_v13 = vld [vmem:[#allocation2 + $0x39] sm:$0xff] }
 0x1a8   :  { %v1285_v7 = vmax.f32 %v1277_v17, 0.0  ;;  %v964_v59 = vadd.f32 %v956_v37, %v938_v30  ;;  %v3104_v22 = vmul.f32 %v1417_v32, %v3069_v42  ;;  %v3110_v20 = vmul.f32 %v1418_v52, %v3069_v42  ;;  %v1421_v30 = vld [vmem:[%s3199_s1 + $0x33] ss:$0 sm:$0xff]  ;;  %v1422_v15 = vld [vmem:[%s3199_s1 + $0x6] ss:$0 sm:$0xff]  ;;  %v3582_v55 = vld [vmem:[#allocation7_spill] sm:$0xff] }
 0x1a9   :  { %v1292_v36 = vmul.f32 2.0, %v1284_v47  ;;  %v1244_v56 = vmul.f32 %v3115_v8, %v1413_v31  ;;  %v1141_v54 = vmul.f32 %v1421_v30, %v1420_v13  ;;  %v434_v44 = vmul.f32 %v1422_v15, %v3074_v35  ;;  %v3577_v4 = vld [vmem:[#allocation124_spill] sm:$0xff]  ;;  %v1423_v13 = vld [vmem:[%s3199_s1 + $0x16] ss:$0 sm:$0xff] }
 0x1aa   :  { %v1293_v24 = vmul.f32 2.0, %v1285_v7  ;;  %v990_v61 = vadd.f32 %v982_v63, %v964_v59  ;;  %v1097_v16 = vadd.f32 %v1089_v23, %v1071_v6  ;;  %v1226_v1 = vadd.f32 %v1218_v25, %v1200_v45  ;;  %v3578_v43 = vld [vmem:[#allocation128_spill] sm:$0xff]  ;;  %v3579_v59 = vld [vmem:[#allocation71_spill] sm:$0xff] }
 0x1ab   :  { %1359 = vst [vmem:[%s3200_s2 + $0xe0] sm:$0xff] %v1292_v36  ;;  %v408_v19 = vmul.f32 %v3577_v4, %v3051_v26  ;;  %v669_v0 = vmul.f32 %v3578_v43, %v3051_v26  ;;  %v931_v47 = vmul.f32 %v2294_v38, %v3051_v26  ;;  %v3580_v11 = vld [vmem:[#allocation72_spill] sm:$0xff]  ;;  %v695_v30 = vmul.f32 %v1423_v13, %v3074_v35 }
 0x1ac   :  { %1360 = vst [vmem:[%s3200_s2 + $0xe8] sm:$0xff] %v1293_v24  ;;  %v1252_v36 = vadd.f32 %v1244_v56, %v1226_v1  ;;  %v1219_v43 = vmul.f32 %v3093_v34, %v3074_v35 }
 0x1ad   :  { %v321_v21 = vld [vmem:[#allocation2 + $0xc8] sm:$0xff] }
 0x1ae   :  { %v476_v9 = vld [vmem:[#allocation2 + $0xc2] sm:$0xff]  ;;  %v330_v60 = vmul.f32 %v2324_v29, %v321_v21  ;;  %v591_v50 = vmul.f32 %v2336_v57, %v321_v21  ;;  %v853_v17 = vmul.f32 %v2341_v40, %v321_v21  ;;  %v1115_v6 = vmul.f32 %v2346_v2, %v321_v21 }
 0x1af   :  { %v485_v10 = vmul.f32 %v2517_v46, %v476_v9  ;;  %v746_v33 = vmul.f32 %v2528_v12, %v476_v9  ;;  %v1008_v45 = vmul.f32 %v2533_v28, %v476_v9  ;;  %v3584_v2 = vld [vmem:[#allocation9_spill] sm:$0xff]  ;;  %v957_v21 = vmul.f32 %v3065_v39, %v3074_v35 }
 0x1b0   :  { %v338_v49 = vadd.f32 %v330_v60, %v3011_v5  ;;  %v599_v29 = vadd.f32 %v591_v50, %v3020_v27  ;;  %v861_v57 = vadd.f32 %v853_v17, %v3030_v62  ;;  %v3581_v5 = vld [vmem:[#allocation73_spill] sm:$0xff]  ;;  %v1123_v27 = vadd.f32 %v1115_v6, %v1097_v16  ;;  %v1424_v60 = vld [vmem:[%s3199_s1 + $0x35] ss:$0 sm:$0xff] }
 0x1b1   :  { %v493_v37 = vadd.f32 %v485_v10, %v467_v48  ;;  %v754_v7 = vadd.f32 %v746_v33, %v728_v53  ;;  %v1016_v14 = vadd.f32 %v1008_v45, %v990_v61  ;;  %v3583_v53 = vld [vmem:[#allocation8_spill] sm:$0xff]  ;;  %v1270_v62 = vmul.f32 %v2554_v3, %v476_v9  ;;  %v477_v61 = vld [vmem:[#allocation2 + $0xca] sm:$0xff] }
 0x1b2   :  { %v364_v24 = vadd.f32 %v3579_v59, %v338_v49  ;;  %v625_v51 = vadd.f32 %v3580_v11, %v599_v29  ;;  %v887_v48 = vadd.f32 %v3581_v5, %v861_v57  ;;  %v1149_v56 = vadd.f32 %v1141_v54, %v1123_v27 }
 0x1b3   :  { %v501_v40 = vmax.f32 %v493_v37, 0.0  ;;  %v762_v31 = vmax.f32 %v754_v7, 0.0  ;;  %v1024_v63 = vmax.f32 %v1016_v14, 0.0  ;;  %v1278_v1 = vadd.f32 %v1270_v62, %v1252_v36 }
 0x1b4   :  { %v390_v58 = vadd.f32 %v3582_v55, %v364_v24  ;;  %v651_v23 = vadd.f32 %v3583_v53, %v625_v51  ;;  %v913_v32 = vadd.f32 %v3584_v2, %v887_v48  ;;  %v1175_v9 = vadd.f32 %v3079_v18, %v1149_v56 }
 0x1b5   :  { %v509_v38 = vmul.f32 2.0, %v501_v40  ;;  %v770_v25 = vmul.f32 2.0, %v762_v31  ;;  %v1032_v52 = vmul.f32 2.0, %v1024_v63  ;;  %v1193_v4 = vmul.f32 %v1424_v60, %v3051_v26 }
 0x1b6   :  { %v416_v15 = vadd.f32 %v408_v19, %v390_v58  ;;  %v677_v16 = vadd.f32 %v669_v0, %v651_v23  ;;  %v939_v54 = vadd.f32 %v931_v47, %v913_v32  ;;  %v983_v19 = vmul.f32 %v3084_v41, %v3069_v42 }
 0x1b7   :  { %517 = vst [vmem:[%s3200_s2 + $0x30] sm:$0xff] %v509_v38  ;;  %v1286_v39 = vmax.f32 %v1278_v1, 0.0  ;;  %v486_v18 = vmul.f32 %v2517_v46, %v477_v61  ;;  %v1201_v33 = vadd.f32 %v1193_v4, %v1175_v9  ;;  %v747_v41 = vmul.f32 %v2528_v12, %v477_v61 }
 0x1b8   :  { %1325 = vst [vmem:[%s3200_s2 + $0x70] sm:$0xff] %v770_v25  ;;  %v442_v10 = vadd.f32 %v434_v44, %v416_v15  ;;  %v703_v50 = vadd.f32 %v695_v30, %v677_v16  ;;  %v965_v0 = vadd.f32 %v957_v21, %v939_v54  ;;  %v1245_v45 = vmul.f32 %v3115_v8, %v3069_v42 }
 0x1b9   :  { %1343 = vst [vmem:[%s3200_s2 + $0xb0] sm:$0xff] %v1032_v52  ;;  %v1294_v44 = vmul.f32 2.0, %v1286_v39  ;;  %v1009_v37 = vmul.f32 %v2533_v28, %v477_v61  ;;  %v1227_v29 = vadd.f32 %v1219_v43, %v1201_v33 }
 0x1ba   :  { %v468_v17 = vadd.f32 %v3104_v22, %v442_v10  ;;  %v729_v26 = vadd.f32 %v3110_v20, %v703_v50  ;;  %v991_v49 = vadd.f32 %v983_v19, %v965_v0  ;;  %v1271_v22 = vmul.f32 %v2554_v3, %v477_v61 }
 0x1bb   :  { %1361 = vst [vmem:[%s3200_s2 + $0xf0] sm:$0xff] %v1294_v44  ;;  %v1253_v34 = vadd.f32 %v1245_v45, %v1227_v29 }
 0x1bc   :  { %v494_v47 = vadd.f32 %v486_v18, %v468_v17  ;;  %v755_v35 = vadd.f32 %v747_v41, %v729_v26  ;;  %v1017_v46 = vadd.f32 %v1009_v37, %v991_v49 }
 0x1bd   :  { %v1279_v57 = vadd.f32 %v1271_v22, %v1253_v34 }
 0x1be   :  { %v502_v20 = vmax.f32 %v494_v47, 0.0  ;;  %v763_v12 = vmax.f32 %v755_v35, 0.0  ;;  %v1025_v7 = vmax.f32 %v1017_v46, 0.0 }
 0x1bf   :  { %v1287_v6 = vmax.f32 %v1279_v57, 0.0 }
 0x1c0   :  { %v510_v14 = vmul.f32 2.0, %v502_v20  ;;  %v771_v42 = vmul.f32 2.0, %v763_v12  ;;  %v1033_v8 = vmul.f32 2.0, %v1025_v7 }
 0x1c1   :  { %v1295_v28 = vmul.f32 2.0, %v1287_v6 }
 0x1c2   :  { %518 = vst [vmem:[%s3200_s2 + $0x38] sm:$0xff] %v510_v14 }
 0x1c3   :  { %1326 = vst [vmem:[%s3200_s2 + $0x78] sm:$0xff] %v771_v42 }
 0x1c4   :  { %1344 = vst [vmem:[%s3200_s2 + $0xb8] sm:$0xff] %v1033_v8 }
 0x1c5   :  { %1362 = vst [vmem:[%s3200_s2 + $0xf8] sm:$0xff] %v1295_v28 }

</bundles_post_ra>
